<compile_context>
chip_gen: v5e
topology: v5e:2x2
jax: 0.10.0
libtpu: 0.0.40
codegen_flags: <defaults>
</compile_context>

<pallas_src>
import jax
import jax.numpy as jnp
from jax.experimental import pallas as pl
from jax.experimental.pallas import tpu as pltpu


# --------------------------------------------------------------------------
# Pallas kernels
# --------------------------------------------------------------------------
def conv_relu_pool_kernel(p_ref, w_ref, b_ref, out_ref):
    """Fused conv (im2col matmul) + 2x2 maxpool + bias + ReLU.

    p_ref  : (4, TM, K)  bf16  -- im2col patches, one slab per pool position
    w_ref  : (K, 128)    bf16  -- conv weight, Cout zero-padded to 128 lanes
    b_ref  : (1, 128)    f32   -- bias, zero-padded
    out_ref: (TM, 128)   f32
    """
    p = p_ref[...]
    npos, tm, k = p.shape
    # One long MXU dispatch over all 4 pool positions at once.
    y = jnp.dot(p.reshape(npos * tm, k), w_ref[...],
                preferred_element_type=jnp.float32)          # (4*TM, 128)
    y = jnp.max(y.reshape(npos, tm, -1), axis=0)             # maxpool over positions
    # Bias hoisted outside the max (bias identical across positions), then ReLU.
    out_ref[...] = jnp.maximum(y + b_ref[...], 0.0)


def mlp_softmax_kernel(x_ref, w1_ref, b1_ref, w2_ref, b2_ref, out_ref):
    """Fused Linear(1600->64) -> Linear(64->10) -> softmax, padded to 128 lanes.

    x_ref : (TB, 1600) bf16
    w1_ref: (1600, 128) bf16 (cols 64.. are zero)
    b1_ref: (1, 128) f32 (cols 64.. are zero)
    w2_ref: (128, 128) bf16 (rows 64.. and cols 10.. are zero)
    b2_ref: (1, 128) f32 (cols 10.. are -1e9 so softmax ignores padding)
    out_ref: (TB, 128) f32
    """
    h = jnp.dot(x_ref[...], w1_ref[...],
                preferred_element_type=jnp.float32) + b1_ref[...]
    logits = jnp.dot(h.astype(w2_ref.dtype), w2_ref[...],
                     preferred_element_type=jnp.float32) + b2_ref[...]
    m = jnp.max(logits, axis=-1, keepdims=True)
    e = jnp.exp(logits - m)
    denom = jnp.sum(e, axis=-1, keepdims=True)
    out_ref[...] = e * pl.reciprocal(denom, approx=True)


# --------------------------------------------------------------------------
# Wrappers
# --------------------------------------------------------------------------
def _round_up(n, m):
    return ((n + m - 1) // m) * m


_NPAD = 128  # lane-dense output width


def conv_block(x_nhwc, w_oihw, b, k):
    """nn.Conv2d(k, stride=1, no pad) -> ReLU -> MaxPool2d(2), via one Pallas call."""
    B, H, W, Cin = x_nhwc.shape
    Cout = w_oihw.shape[0]
    Ho = H - k + 1
    P = Ho // 2                      # MaxPool2d(2) floor, drops odd trailing row/col
    K = Cin * k * k
    M = B * P * P

    # Pool-aware im2col: directly build (4, M, K) without the full im2col
    # intermediate or 4 separate HBM arrays. K flattening order is (cin, kh, kw),
    # matching torch weight.reshape(Cout, Cin*k*k).
    pos_slabs = []
    for di in range(2):
        for dj in range(2):
            cols = []
            for i in range(k):
                for j in range(k):
                    cols.append(x_nhwc[:, di + i: di + i + 2 * P: 2,
                                       dj + j: dj + j + 2 * P: 2, :])
            patch = jnp.stack(cols, axis=-1)                  # (B, P, P, Cin, k*k)
            pos_slabs.append(patch.reshape(M, K))
    patches = jnp.stack(pos_slabs, axis=0).astype(jnp.bfloat16)   # (4, M, K)

    # Tile the M axis; keep tiles modest so 4 slabs x 2 pipeline buffers fit
    # comfortably in v7x's smaller VMEM.
    TM = min(512, _round_up(M, 8))
    M_pad = _round_up(M, TM)
    if M_pad != M:
        patches = jnp.pad(patches, ((0, 0), (0, M_pad - M), (0, 0)))

    wmat = w_oihw.reshape(Cout, K).T.astype(jnp.bfloat16)         # (K, Cout)
    wmat = jnp.pad(wmat, ((0, 0), (0, _NPAD - Cout)))
    bmat = jnp.pad(b.reshape(1, Cout).astype(jnp.float32),
                   ((0, 0), (0, _NPAD - Cout)))

    out = pl.pallas_call(
        conv_relu_pool_kernel,
        out_shape=jax.ShapeDtypeStruct((M_pad, _NPAD), jnp.float32),
        grid=(M_pad // TM,),
        in_specs=[
            pl.BlockSpec((4, TM, K), lambda i: (0, i, 0)),
            pl.BlockSpec((K, _NPAD), lambda i: (0, 0)),       # resident weight
            pl.BlockSpec((1, _NPAD), lambda i: (0, 0)),       # resident bias
        ],
        out_specs=pl.BlockSpec((TM, _NPAD), lambda i: (i, 0)),
        compiler_params=pltpu.CompilerParams(
            dimension_semantics=("parallel",)),
    )(patches, wmat, bmat)

    return out[:M, :Cout].reshape(B, P, P, Cout)


def mlp_softmax(flat, w1, b1, w2, b2):
    """Linear(1600,64) -> Linear(64,10) -> softmax(dim=1), via one Pallas call."""
    B, F = flat.shape
    Hid = w1.shape[1]      # 64
    C = w2.shape[1]        # 10

    TB = min(128, _round_up(B, 8))
    B_pad = _round_up(B, TB)
    x = flat.astype(jnp.bfloat16)
    if B_pad != B:
        x = jnp.pad(x, ((0, B_pad - B), (0, 0)))

    w1p = jnp.pad(w1.astype(jnp.bfloat16), ((0, 0), (0, _NPAD - Hid)))
    b1p = jnp.pad(b1.reshape(1, Hid).astype(jnp.float32), ((0, 0), (0, _NPAD - Hid)))
    w2p = jnp.pad(w2.astype(jnp.bfloat16), ((0, _NPAD - Hid), (0, _NPAD - C)))
    b2p = jnp.pad(b2.reshape(1, C).astype(jnp.float32),
                  ((0, 0), (0, _NPAD - C)), constant_values=-1e9)

    out = pl.pallas_call(
        mlp_softmax_kernel,
        out_shape=jax.ShapeDtypeStruct((B_pad, _NPAD), jnp.float32),
        grid=(B_pad // TB,),
        in_specs=[
            pl.BlockSpec((TB, F), lambda i: (i, 0)),
            pl.BlockSpec((F, _NPAD), lambda i: (0, 0)),       # fc1 weight resident
            pl.BlockSpec((1, _NPAD), lambda i: (0, 0)),
            pl.BlockSpec((_NPAD, _NPAD), lambda i: (0, 0)),   # fc2 weight resident
            pl.BlockSpec((1, _NPAD), lambda i: (0, 0)),
        ],
        out_specs=pl.BlockSpec((TB, _NPAD), lambda i: (i, 0)),
        compiler_params=pltpu.CompilerParams(
            dimension_semantics=("parallel",)),
    )(x, w1p, b1p, w2p, b2p)

    return out[:B, :C]


def basic_cnn_forward(x_nchw, params):
    """Forward pass matching torch basic_CNN. x: (B, 1, 28, 28) float32."""
    B = x_nchw.shape[0]
    x = jnp.transpose(x_nchw, (0, 2, 3, 1))                          # NCHW -> NHWC

    h1 = conv_block(x, params["conv1_w"], params["conv1_b"], 3)      # (B, 13, 13, 32)
    h2 = conv_block(h1, params["conv2_w"], params["conv2_b"], 3)     # (B, 5, 5, 64)

    # Flatten in torch's NCHW order: (B, C, H, W) -> (B, 1600)
    flat = jnp.transpose(h2, (0, 3, 1, 2)).reshape(B, -1)

    return mlp_softmax(flat, params["fc1_w"], params["fc1_b"],
                       params["fc2_w"], params["fc2_b"])


# --------------------------------------------------------------------------
# Deterministic parameter construction (shapes from basic_CNN.__init__)
# --------------------------------------------------------------------------
def init_params(key):
    ks = jax.random.split(key, 8)
    s = 0.05
    return {
        # torch Conv2d weight layout (Cout, Cin, kh, kw)
        "conv1_w": s * jax.random.normal(ks[0], (32, 1, 3, 3), jnp.float32),
        "conv1_b": s * jax.random.normal(ks[1], (32,), jnp.float32),
        "conv2_w": s * jax.random.normal(ks[2], (64, 32, 3, 3), jnp.float32),
        "conv2_b": s * jax.random.normal(ks[3], (64,), jnp.float32),
        # Linear weights stored pre-transposed for x @ W: (in, out)
        "fc1_w": s * jax.random.normal(ks[4], (1600, 64), jnp.float32),
        "fc1_b": s * jax.random.normal(ks[5], (64,), jnp.float32),
        "fc2_w": s * jax.random.normal(ks[6], (64, 10), jnp.float32),
        "fc2_b": s * jax.random.normal(ks[7], (10,), jnp.float32),
    }


if __name__ == "__main__":
    key = jax.random.PRNGKey(0)
    k_x, k_p = jax.random.split(key)

    # MNIST-shaped input (28x28 is required by the 1600-wide fc_layer1).
    batch = 2
    x = jax.random.normal(k_x, (batch, 1, 28, 28), jnp.float32)
    params = init_params(k_p)

    fwd = jax.jit(basic_cnn_forward)
    probs = jax.block_until_ready(fwd(x, params))

    assert probs.shape == (batch, 10)
    max_dev = float(jnp.max(jnp.abs(jnp.sum(probs, axis=1) - 1.0)))
    assert max_dev < 1e-2, f"softmax rows do not sum to 1 (max dev {max_dev})"
    print("KERNEL_OK")
</pallas_src>

<mosaic_0001>
module attributes {stable_mosaic.version = 11 : i64} {
  func.func @conv_relu_pool_kernel(%arg0: i32, %arg1: memref<4x344x9xbf16, #tpu.memory_space<vmem>>, %arg2: memref<9x128xbf16, #tpu.memory_space<vmem>>, %arg3: memref<1x128xf32, #tpu.memory_space<vmem>>, %arg4: memref<344x128xf32, #tpu.memory_space<vmem>>) attributes {dimension_semantics = [#tpu.dimension_semantics<parallel>], iteration_bounds = array<i64: 1>, scalar_prefetch = 0 : i64, scratch_operands = 0 : i64, tpu.core_type = #tpu.core_type<tc>, window_params = [{transform_indices = @transform_0, window_bounds = array<i64: 4, 344, 9>}, {pipeline_mode = #tpu.pipeline_mode<synchronous>, transform_indices = @transform_1, window_bounds = array<i64: 9, 128>}, {pipeline_mode = #tpu.pipeline_mode<synchronous>, transform_indices = @transform_2, window_bounds = array<i64: 1, 128>}, {transform_indices = @transform_3, window_bounds = array<i64: 344, 128>}]} {
    %c0 = arith.constant 0 : index
    %c0_0 = arith.constant 0 : index
    %c0_1 = arith.constant 0 : index
    %0 = vector.load %arg1[%c0, %c0_0, %c0_1] : memref<4x344x9xbf16, #tpu.memory_space<vmem>>, vector<4x344x9xbf16>
    %1 = vector.shape_cast %0 : vector<4x344x9xbf16> to vector<1376x9xbf16>
    %c0_2 = arith.constant 0 : index
    %c0_3 = arith.constant 0 : index
    %2 = vector.load %arg2[%c0_2, %c0_3] : memref<9x128xbf16, #tpu.memory_space<vmem>>, vector<9x128xbf16>
    %cst = arith.constant dense<0.000000e+00> : vector<1376x128xf32>
    %3 = tpu.matmul %1, %2, %cst {dimension_numbers = #tpu.dot_dimension_numbers<[1], [0], [0], [1], [0, 0, 1, 1], [], []>} : vector<1376x9xbf16>, vector<9x128xbf16>, vector<1376x128xf32> -> vector<1376x128xf32>
    %4 = vector.shape_cast %3 : vector<1376x128xf32> to vector<4x344x128xf32>
    %cst_4 = arith.constant dense<0xFF800000> : vector<344x128xf32>
    %5 = vector.multi_reduction <maximumf>, %4, %cst_4 [0] : vector<4x344x128xf32> to vector<344x128xf32>
    %c0_5 = arith.constant 0 : index
    %c0_6 = arith.constant 0 : index
    %6 = vector.load %arg3[%c0_5, %c0_6] : memref<1x128xf32, #tpu.memory_space<vmem>>, vector<1x128xf32>
    %7 = vector.broadcast %6 : vector<1x128xf32> to vector<344x128xf32>
    %8 = arith.addf %5, %7 : vector<344x128xf32>
    %cst_7 = arith.constant 0.000000e+00 : f32
    %9 = vector.broadcast %cst_7 : f32 to vector<344x128xf32>
    %10 = arith.maximumf %8, %9 : vector<344x128xf32>
    %c0_8 = arith.constant 0 : index
    %c0_9 = arith.constant 0 : index
    %11 = vector.load %arg4[%c0_8, %c0_9] : memref<344x128xf32, #tpu.memory_space<vmem>>, vector<344x128xf32>
    tpu.vector_store %arg4[%c0_8, %c0_9], %10 {strides = array<i32>} : memref<344x128xf32, #tpu.memory_space<vmem>>, vector<344x128xf32>,
    return
  }
  func.func @transform_0(%arg0: i32) -> (i32, i32, i32) {
    %c0_i32 = arith.constant 0 : i32
    %c0_i32_0 = arith.constant 0 : i32
    %c0_i32_1 = arith.constant 0 : i32
    return %c0_i32, %arg0, %c0_i32_0 : i32, i32, i32
  }
  func.func @transform_1(%arg0: i32) -> (i32, i32) {
    %c0_i32 = arith.constant 0 : i32
    %c0_i32_0 = arith.constant 0 : i32
    %c0_i32_1 = arith.constant 0 : i32
    return %c0_i32, %c0_i32_0 : i32, i32
  }
  func.func @transform_2(%arg0: i32) -> (i32, i32) {
    %c0_i32 = arith.constant 0 : i32
    %c0_i32_0 = arith.constant 0 : i32
    %c0_i32_1 = arith.constant 0 : i32
    return %c0_i32, %c0_i32_0 : i32, i32
  }
  func.func @transform_3(%arg0: i32) -> (i32, i32) {
    %c0_i32 = arith.constant 0 : i32
    %c0_i32_0 = arith.constant 0 : i32
    return %arg0, %c0_i32 : i32, i32
  }
}

module attributes {stable_mosaic.version = 11 : i64} {
  func.func @conv_relu_pool_kernel(%arg0: i32, %arg1: memref<4x56x288xbf16, #tpu.memory_space<vmem>>, %arg2: memref<288x128xbf16, #tpu.memory_space<vmem>>, %arg3: memref<1x128xf32, #tpu.memory_space<vmem>>, %arg4: memref<56x128xf32, #tpu.memory_space<vmem>>) attributes {dimension_semantics = [#tpu.dimension_semantics<parallel>], iteration_bounds = array<i64: 1>, scalar_prefetch = 0 : i64, scratch_operands = 0 : i64, tpu.core_type = #tpu.core_type<tc>, window_params = [{transform_indices = @transform_0, window_bounds = array<i64: 4, 56, 288>}, {pipeline_mode = #tpu.pipeline_mode<synchronous>, transform_indices = @transform_1, window_bounds = array<i64: 288, 128>}, {pipeline_mode = #tpu.pipeline_mode<synchronous>, transform_indices = @transform_2, window_bounds = array<i64: 1, 128>}, {transform_indices = @transform_3, window_bounds = array<i64: 56, 128>}]} {
    %c0 = arith.constant 0 : index
    %c0_0 = arith.constant 0 : index
    %c0_1 = arith.constant 0 : index
    %0 = vector.load %arg1[%c0, %c0_0, %c0_1] : memref<4x56x288xbf16, #tpu.memory_space<vmem>>, vector<4x56x288xbf16>
    %1 = vector.shape_cast %0 : vector<4x56x288xbf16> to vector<224x288xbf16>
    %c0_2 = arith.constant 0 : index
    %c0_3 = arith.constant 0 : index
    %2 = vector.load %arg2[%c0_2, %c0_3] : memref<288x128xbf16, #tpu.memory_space<vmem>>, vector<288x128xbf16>
    %cst = arith.constant dense<0.000000e+00> : vector<224x128xf32>
    %3 = tpu.matmul %1, %2, %cst {dimension_numbers = #tpu.dot_dimension_numbers<[1], [0], [0], [1], [0, 0, 1, 1], [], []>} : vector<224x288xbf16>, vector<288x128xbf16>, vector<224x128xf32> -> vector<224x128xf32>
    %4 = vector.shape_cast %3 : vector<224x128xf32> to vector<4x56x128xf32>
    %cst_4 = arith.constant dense<0xFF800000> : vector<56x128xf32>
    %5 = vector.multi_reduction <maximumf>, %4, %cst_4 [0] : vector<4x56x128xf32> to vector<56x128xf32>
    %c0_5 = arith.constant 0 : index
    %c0_6 = arith.constant 0 : index
    %6 = vector.load %arg3[%c0_5, %c0_6] : memref<1x128xf32, #tpu.memory_space<vmem>>, vector<1x128xf32>
    %7 = vector.broadcast %6 : vector<1x128xf32> to vector<56x128xf32>
    %8 = arith.addf %5, %7 : vector<56x128xf32>
    %cst_7 = arith.constant 0.000000e+00 : f32
    %9 = vector.broadcast %cst_7 : f32 to vector<56x128xf32>
    %10 = arith.maximumf %8, %9 : vector<56x128xf32>
    %c0_8 = arith.constant 0 : index
    %c0_9 = arith.constant 0 : index
    %11 = vector.load %arg4[%c0_8, %c0_9] : memref<56x128xf32, #tpu.memory_space<vmem>>, vector<56x128xf32>
    tpu.vector_store %arg4[%c0_8, %c0_9], %10 {strides = array<i32>} : memref<56x128xf32, #tpu.memory_space<vmem>>, vector<56x128xf32>,
    return
  }
  func.func @transform_0(%arg0: i32) -> (i32, i32, i32) {
    %c0_i32 = arith.constant 0 : i32
    %c0_i32_0 = arith.constant 0 : i32
    %c0_i32_1 = arith.constant 0 : i32
    return %c0_i32, %arg0, %c0_i32_0 : i32, i32, i32
  }
  func.func @transform_1(%arg0: i32) -> (i32, i32) {
    %c0_i32 = arith.constant 0 : i32
    %c0_i32_0 = arith.constant 0 : i32
    %c0_i32_1 = arith.constant 0 : i32
    return %c0_i32, %c0_i32_0 : i32, i32
  }
  func.func @transform_2(%arg0: i32) -> (i32, i32) {
    %c0_i32 = arith.constant 0 : i32
    %c0_i32_0 = arith.constant 0 : i32
    %c0_i32_1 = arith.constant 0 : i32
    return %c0_i32, %c0_i32_0 : i32, i32
  }
  func.func @transform_3(%arg0: i32) -> (i32, i32) {
    %c0_i32 = arith.constant 0 : i32
    %c0_i32_0 = arith.constant 0 : i32
    return %arg0, %c0_i32 : i32, i32
  }
}

module attributes {stable_mosaic.version = 11 : i64} {
  func.func @mlp_softmax_kernel(%arg0: i32, %arg1: memref<8x1600xbf16, #tpu.memory_space<vmem>>, %arg2: memref<1600x128xbf16, #tpu.memory_space<vmem>>, %arg3: memref<1x128xf32, #tpu.memory_space<vmem>>, %arg4: memref<128x128xbf16, #tpu.memory_space<vmem>>, %arg5: memref<1x128xf32, #tpu.memory_space<vmem>>, %arg6: memref<8x128xf32, #tpu.memory_space<vmem>>) attributes {dimension_semantics = [#tpu.dimension_semantics<parallel>], iteration_bounds = array<i64: 1>, scalar_prefetch = 0 : i64, scratch_operands = 0 : i64, tpu.core_type = #tpu.core_type<tc>, window_params = [{transform_indices = @transform_0, window_bounds = array<i64: 8, 1600>}, {pipeline_mode = #tpu.pipeline_mode<synchronous>, transform_indices = @transform_1, window_bounds = array<i64: 1600, 128>}, {pipeline_mode = #tpu.pipeline_mode<synchronous>, transform_indices = @transform_2, window_bounds = array<i64: 1, 128>}, {pipeline_mode = #tpu.pipeline_mode<synchronous>, transform_indices = @transform_3, window_bounds = array<i64: 128, 128>}, {pipeline_mode = #tpu.pipeline_mode<synchronous>, transform_indices = @transform_4, window_bounds = array<i64: 1, 128>}, {transform_indices = @transform_5, window_bounds = array<i64: 8, 128>}]} {
    %c0 = arith.constant 0 : index
    %c0_0 = arith.constant 0 : index
    %0 = vector.load %arg1[%c0, %c0_0] : memref<8x1600xbf16, #tpu.memory_space<vmem>>, vector<8x1600xbf16>
    %c0_1 = arith.constant 0 : index
    %c0_2 = arith.constant 0 : index
    %1 = vector.load %arg2[%c0_1, %c0_2] : memref<1600x128xbf16, #tpu.memory_space<vmem>>, vector<1600x128xbf16>
    %cst = arith.constant dense<0.000000e+00> : vector<8x128xf32>
    %2 = tpu.matmul %0, %1, %cst {dimension_numbers = #tpu.dot_dimension_numbers<[1], [0], [0], [1], [0, 0, 1, 1], [], []>} : vector<8x1600xbf16>, vector<1600x128xbf16>, vector<8x128xf32> -> vector<8x128xf32>
    %c0_3 = arith.constant 0 : index
    %c0_4 = arith.constant 0 : index
    %3 = vector.load %arg3[%c0_3, %c0_4] : memref<1x128xf32, #tpu.memory_space<vmem>>, vector<1x128xf32>
    %4 = vector.broadcast %3 : vector<1x128xf32> to vector<8x128xf32>
    %5 = arith.addf %2, %4 : vector<8x128xf32>
    %6 = arith.truncf %5 : vector<8x128xf32> to vector<8x128xbf16>
    %c0_5 = arith.constant 0 : index
    %c0_6 = arith.constant 0 : index
    %7 = vector.load %arg4[%c0_5, %c0_6] : memref<128x128xbf16, #tpu.memory_space<vmem>>, vector<128x128xbf16>
    %cst_7 = arith.constant dense<0.000000e+00> : vector<8x128xf32>
    %8 = tpu.matmul %6, %7, %cst_7 {dimension_numbers = #tpu.dot_dimension_numbers<[1], [0], [0], [1], [0, 0, 1, 1], [], []>} : vector<8x128xbf16>, vector<128x128xbf16>, vector<8x128xf32> -> vector<8x128xf32>
    %c0_8 = arith.constant 0 : index
    %c0_9 = arith.constant 0 : index
    %9 = vector.load %arg5[%c0_8, %c0_9] : memref<1x128xf32, #tpu.memory_space<vmem>>, vector<1x128xf32>
    %10 = vector.broadcast %9 : vector<1x128xf32> to vector<8x128xf32>
    %11 = arith.addf %8, %10 : vector<8x128xf32>
    %cst_10 = arith.constant dense<0xFF800000> : vector<8xf32>
    %12 = vector.multi_reduction <maximumf>, %11, %cst_10 [1] : vector<8x128xf32> to vector<8xf32>
    %13 = vector.shape_cast %12 : vector<8xf32> to vector<8x1xf32>
    %14 = vector.broadcast %13 : vector<8x1xf32> to vector<8x128xf32>
    %15 = arith.subf %11, %14 : vector<8x128xf32>
    %16 = math.exp %15 : vector<8x128xf32>
    %cst_11 = arith.constant dense<0.000000e+00> : vector<8xf32>
    %17 = vector.multi_reduction <add>, %16, %cst_11 [1] : vector<8x128xf32> to vector<8xf32>
    %18 = vector.shape_cast %17 : vector<8xf32> to vector<8x1xf32>
    %19 = tpu.reciprocal %18 {approx = true} : vector<8x1xf32> -> vector<8x1xf32>
    %20 = vector.broadcast %19 : vector<8x1xf32> to vector<8x128xf32>
    %21 = arith.mulf %16, %20 : vector<8x128xf32>
    %c0_12 = arith.constant 0 : index
    %c0_13 = arith.constant 0 : index
    %22 = vector.load %arg6[%c0_12, %c0_13] : memref<8x128xf32, #tpu.memory_space<vmem>>, vector<8x128xf32>
    tpu.vector_store %arg6[%c0_12, %c0_13], %21 {strides = array<i32>} : memref<8x128xf32, #tpu.memory_space<vmem>>, vector<8x128xf32>,
    return
  }
  func.func @transform_0(%arg0: i32) -> (i32, i32) {
    %c0_i32 = arith.constant 0 : i32
    %c0_i32_0 = arith.constant 0 : i32
    return %arg0, %c0_i32 : i32, i32
  }
  func.func @transform_1(%arg0: i32) -> (i32, i32) {
    %c0_i32 = arith.constant 0 : i32
    %c0_i32_0 = arith.constant 0 : i32
    %c0_i32_1 = arith.constant 0 : i32
    return %c0_i32, %c0_i32_0 : i32, i32
  }
  func.func @transform_2(%arg0: i32) -> (i32, i32) {
    %c0_i32 = arith.constant 0 : i32
    %c0_i32_0 = arith.constant 0 : i32
    %c0_i32_1 = arith.constant 0 : i32
    return %c0_i32, %c0_i32_0 : i32, i32
  }
  func.func @transform_3(%arg0: i32) -> (i32, i32) {
    %c0_i32 = arith.constant 0 : i32
    %c0_i32_0 = arith.constant 0 : i32
    %c0_i32_1 = arith.constant 0 : i32
    return %c0_i32, %c0_i32_0 : i32, i32
  }
  func.func @transform_4(%arg0: i32) -> (i32, i32) {
    %c0_i32 = arith.constant 0 : i32
    %c0_i32_0 = arith.constant 0 : i32
    %c0_i32_1 = arith.constant 0 : i32
    return %c0_i32, %c0_i32_0 : i32, i32
  }
  func.func @transform_5(%arg0: i32) -> (i32, i32) {
    %c0_i32 = arith.constant 0 : i32
    %c0_i32_0 = arith.constant 0 : i32
    return %arg0, %c0_i32 : i32, i32
  }
}

</mosaic_0001>

<bundles_post_ra>
// kernel: basic_cnn_forward.3
= control target key start
LH: loop header
LB: loop body
LE: loop exit
PB: predicated region body
PF: predicated region fallthrough
CT: control target
= control target key end

     0   :  { %vm883_vm0 = vcmask 1043456   ;;  %vm884_vm1 = vcmask 1044480   ;;  %v2121_v2 = vmov 65535   ;;  %vm624_vm2 = vcmask 72704   ;;  %s2684_s1 = inlined_call_operand.vmem [shape: bf16[9,128], index: 1, kind: input, shape index: {}]   ;;  %s2685_s0 = inlined_call_operand.vmem [shape: bf16[4,344,9], index: 0, kind: input, shape index: {}]   ;;  %s2686_s2 = inlined_call_operand.vmem [shape: f32[1,128], index: 2, kind: input, shape index: {}]   ;;  %s2687_s3 = inlined_call_operand.vmem [shape: f32[344,128], index: 3, kind: output, shape index: {}]  }
   0x1   :  { %v1941_v0 = vld [vmem:[%s2684_s1] sm:$0xf]  ;;  %v2115_v1 = vld [vmem:[%s2684_s1] sm:$0x10]  ;;  %v885_v3 = vsel %vm883_vm0, 4294967295, %v2121_v2  ;;  %v2051_v8 = vld [vmem:[%s2685_s0 + $0xb0] sm:$0xff] }
   0x2   :  { %v1942_v4 = vor.u32 %v2115_v1, %v1941_v0  ;;  %v886_v5 = vsel %vm884_vm1, %v885_v3, 0  ;;  %v2029_v7 = vld [vmem:[%s2685_s0] sm:$0xff]  ;;  %v2095_v10 = vld [vmem:[%s2685_s0 + $0x210] sm:$0xff]  ;;  %v2030_v11 = vld [vmem:[%s2685_s0 + $0x8] sm:$0xff] }
   0x3   :  { %v2073_v9 = vld [vmem:[%s2685_s0 + $0x160] sm:$0xff]  ;;  %v2052_v12 = vld [vmem:[%s2685_s0 + $0xb8] sm:$0xff]  ;;  %v2074_v13 = vld [vmem:[%s2685_s0 + $0x168] sm:$0xff] }
   0x4   :  { %v888_v6 = vand.u32 %v1942_v4, %v886_v5  ;;  %v2096_v14 = vld [vmem:[%s2685_s0 + $0x218] sm:$0xff]  ;;  %v2031_v15 = vld [vmem:[%s2685_s0 + $0x10] sm:$0xff]  ;;  %v2053_v16 = vld [vmem:[%s2685_s0 + $0xc0] sm:$0xff] }
   0x5   :  { %v2075_v17 = vld [vmem:[%s2685_s0 + $0x170] sm:$0xff]  ;;  %v2097_v18 = vld [vmem:[%s2685_s0 + $0x220] sm:$0xff]  ;;  %v2032_v19 = vld [vmem:[%s2685_s0 + $0x18] sm:$0xff] }
   0x6   :  { %897 = vmatpush.bf16.msra.mxu0 %v888_v6  ;;  %2116 = vmatpush.bf16.msra.mxu1 %v888_v6  ;;  %v2054_v20 = vld [vmem:[%s2685_s0 + $0xc8] sm:$0xff]  ;;  %v2076_v21 = vld [vmem:[%s2685_s0 + $0x178] sm:$0xff]  ;;  %v2033_v23 = vld [vmem:[%s2685_s0 + $0x20] sm:$0xff] }
   0x7   :  { %2117 = vmatpush.bf16.msra.mxu2 %v888_v6  ;;  %2118 = vmatpush.bf16.msra.mxu3 %v888_v6  ;;  %v2098_v22 = vld [vmem:[%s2685_s0 + $0x228] sm:$0xff]  ;;  %v2055_v24 = vld [vmem:[%s2685_s0 + $0xd0] sm:$0xff]  ;;  %v2077_v25 = vld [vmem:[%s2685_s0 + $0x180] sm:$0xff] }
   0x8   :  { %v2099_v26 = vld [vmem:[%s2685_s0 + $0x230] sm:$0xff]  ;;  %v2034_v27 = vld [vmem:[%s2685_s0 + $0x28] sm:$0xff]  ;;  %v2056_v28 = vld [vmem:[%s2685_s0 + $0xd8] sm:$0xff] }
   0x9   :  { %1943 = vmatmul.msk.bf16.vlgmr.msra.gmra.mxu0 %vm624_vm2, %v2029_v7  ;;  %1965 = vmatmul.msk.bf16.vlgmr.msra.gmra.mxu1 %vm624_vm2, %v2051_v8  ;;  %v2078_v29 = vld [vmem:[%s2685_s0 + $0x188] sm:$0xff]  ;;  %v2100_v30 = vld [vmem:[%s2685_s0 + $0x238] sm:$0xff]  ;;  %v2035_v31 = vld [vmem:[%s2685_s0 + $0x30] sm:$0xff] }
   0xa   :  { %1987 = vmatmul.msk.bf16.vlgmr.msra.gmra.mxu2 %vm624_vm2, %v2073_v9  ;;  %2009 = vmatmul.msk.bf16.vlgmr.msra.gmra.mxu3 %vm624_vm2, %v2095_v10  ;;  %v2057_v32 = vld [vmem:[%s2685_s0 + $0xe0] sm:$0xff]  ;;  %v2079_v33 = vld [vmem:[%s2685_s0 + $0x190] sm:$0xff]  ;;  %v2036_v35 = vld [vmem:[%s2685_s0 + $0x38] sm:$0xff] }
   0xb   :  { %v2101_v34 = vld [vmem:[%s2685_s0 + $0x240] sm:$0xff]  ;;  %v2058_v36 = vld [vmem:[%s2685_s0 + $0xe8] sm:$0xff]  ;;  %v2080_v37 = vld [vmem:[%s2685_s0 + $0x198] sm:$0xff] }
   0xc   :  { %v2102_v38 = vld [vmem:[%s2685_s0 + $0x248] sm:$0xff]  ;;  %v2037_v39 = vld [vmem:[%s2685_s0 + $0x40] sm:$0xff]  ;;  %v2059_v40 = vld [vmem:[%s2685_s0 + $0xf0] sm:$0xff] }
   0xd   :  { %v2081_v43 = vld [vmem:[%s2685_s0 + $0x1a0] sm:$0xff]  ;;  %v2103_v44 = vld [vmem:[%s2685_s0 + $0x250] sm:$0xff]  ;;  %v2038_v51 = vld [vmem:[%s2685_s0 + $0x48] sm:$0xff] }
   0xe   :  { %v2060_v52 = vld [vmem:[%s2685_s0 + $0xf8] sm:$0xff]  ;;  %v2082_v56 = vld [vmem:[%s2685_s0 + $0x1a8] sm:$0xff]  ;;  %v2321_v2 = vld [vmem:[%s2686_s2] ss:$0 sm:$0xff] }
   0xf   :  { %v2104_v57 = vld [vmem:[%s2685_s0 + $0x258] sm:$0xff]  ;;  %v2039_v6 = vld [vmem:[%s2685_s0 + $0x50] sm:$0xff]  ;;  %v2061_v7 = vld [vmem:[%s2685_s0 + $0x100] sm:$0xff] }
  0x19   :  { %1944 = vmatmul.msk.bf16.gmra.mxu0 %vm624_vm2, %v2030_v11  ;;  %1966 = vmatmul.msk.bf16.gmra.mxu1 %vm624_vm2, %v2052_v12  ;;  %v2083_v11 = vld [vmem:[%s2685_s0 + $0x1b0] sm:$0xff]  ;;  %v2105_v12 = vld [vmem:[%s2685_s0 + $0x260] sm:$0xff] }
  0x1a   :  { %1988 = vmatmul.msk.bf16.gmra.mxu2 %vm624_vm2, %v2074_v13  ;;  %2010 = vmatmul.msk.bf16.gmra.mxu3 %vm624_vm2, %v2096_v14 }
  0x29   :  { %1945 = vmatmul.msk.bf16.gmra.mxu0 %vm624_vm2, %v2031_v15  ;;  %1967 = vmatmul.msk.bf16.gmra.mxu1 %vm624_vm2, %v2053_v16 }
  0x2a   :  { %1989 = vmatmul.msk.bf16.gmra.mxu2 %vm624_vm2, %v2075_v17  ;;  %2011 = vmatmul.msk.bf16.gmra.mxu3 %vm624_vm2, %v2097_v18 }
  0x39   :  { %1946 = vmatmul.msk.bf16.gmra.mxu0 %vm624_vm2, %v2032_v19  ;;  %1968 = vmatmul.msk.bf16.gmra.mxu1 %vm624_vm2, %v2054_v20 }
  0x3a   :  { %1990 = vmatmul.msk.bf16.gmra.mxu2 %vm624_vm2, %v2076_v21  ;;  %2012 = vmatmul.msk.bf16.gmra.mxu3 %vm624_vm2, %v2098_v22 }
  0x49   :  { %1947 = vmatmul.msk.bf16.gmra.mxu0 %vm624_vm2, %v2033_v23  ;;  %1969 = vmatmul.msk.bf16.gmra.mxu1 %vm624_vm2, %v2055_v24 }
  0x4a   :  { %1991 = vmatmul.msk.bf16.gmra.mxu2 %vm624_vm2, %v2077_v25  ;;  %2013 = vmatmul.msk.bf16.gmra.mxu3 %vm624_vm2, %v2099_v26 }
  0x59   :  { %1948 = vmatmul.msk.bf16.gmra.mxu0 %vm624_vm2, %v2034_v27  ;;  %1970 = vmatmul.msk.bf16.gmra.mxu1 %vm624_vm2, %v2056_v28  ;;  %v2040_v28 = vld [vmem:[%s2685_s0 + $0x58] sm:$0xff] }
  0x5a   :  { %1992 = vmatmul.msk.bf16.gmra.mxu2 %vm624_vm2, %v2078_v29  ;;  %2014 = vmatmul.msk.bf16.gmra.mxu3 %vm624_vm2, %v2100_v30  ;;  %v2062_v29 = vld [vmem:[%s2685_s0 + $0x108] sm:$0xff] }
  0x69   :  { %1949 = vmatmul.msk.bf16.gmra.mxu0 %vm624_vm2, %v2035_v31  ;;  %1971 = vmatmul.msk.bf16.gmra.mxu1 %vm624_vm2, %v2057_v32 }
  0x6a   :  { %1993 = vmatmul.msk.bf16.gmra.mxu2 %vm624_vm2, %v2079_v33  ;;  %2015 = vmatmul.msk.bf16.gmra.mxu3 %vm624_vm2, %v2101_v34  ;;  %v2084_v33 = vld [vmem:[%s2685_s0 + $0x1b8] sm:$0xff]  ;;  %v2106_v34 = vld [vmem:[%s2685_s0 + $0x268] sm:$0xff] }
  0x79   :  { %1950 = vmatmul.msk.bf16.gmra.mxu0 %vm624_vm2, %v2036_v35  ;;  %1972 = vmatmul.msk.bf16.gmra.mxu1 %vm624_vm2, %v2058_v36 }
  0x7a   :  { %1994 = vmatmul.msk.bf16.gmra.mxu2 %vm624_vm2, %v2080_v37  ;;  %2016 = vmatmul.msk.bf16.gmra.mxu3 %vm624_vm2, %v2102_v38 }
  0x86   :  { %v2282_v41 = vpop.f32.mrf.mxu0  ;;  %v2284_v42 = vpop.f32.mrf.mxu1 }
  0x89   :  { %1951 = vmatmul.msk.bf16.gmra.mxu0 %vm624_vm2, %v2037_v39  ;;  %1973 = vmatmul.msk.bf16.gmra.mxu1 %vm624_vm2, %v2059_v40 }
  0x8a   :  { %1995 = vmatmul.msk.bf16.gmra.mxu2 %vm624_vm2, %v2081_v43  ;;  %2017 = vmatmul.msk.bf16.gmra.mxu3 %vm624_vm2, %v2103_v44 }
  0x8d   :  { %v1119_v45 = vpop.f32.mrf.mxu2  ;;  %v1229_v46 = vpop.f32.mrf.mxu3 }
  0x8e   :  { %v2296_v47 = vpop.f32.mrf.mxu0  ;;  %v1011_v48 = vpop.f32.mrf.mxu1 }
  0x8f   :  { %v1332_v49 = vmax.f32 %v2296_v47, %v2284_v42 }
  0x95   :  { %v1121_v50 = vpop.f32.mrf.mxu2  ;;  %v1231_v53 = vpop.f32.mrf.mxu3 }
  0x96   :  { %v904_v54 = vpop.f32.mrf.mxu0  ;;  %v1014_v55 = vpop.f32.mrf.mxu1 }
  0x97   :  { %v1335_v58 = vmax.f32 %v904_v54, %v1011_v48  ;;  %v2041_v54 = vld [vmem:[%s2685_s0 + $0x60] sm:$0xff] }
  0x99   :  { %1952 = vmatmul.msk.bf16.gmra.mxu0 %vm624_vm2, %v2038_v51  ;;  %1974 = vmatmul.msk.bf16.gmra.mxu1 %vm624_vm2, %v2060_v52  ;;  %v2314_v59 = vmax.f32 %v1335_v58, %v1119_v45 }
  0x9a   :  { %1996 = vmatmul.msk.bf16.gmra.mxu2 %vm624_vm2, %v2082_v56  ;;  %2018 = vmatmul.msk.bf16.gmra.mxu3 %vm624_vm2, %v2104_v57 }
  0x9d   :  { %v1124_v60 = vpop.f32.mrf.mxu2  ;;  %v1234_v61 = vpop.f32.mrf.mxu3 }
  0x9e   :  { %v906_v62 = vpop.f32.mrf.mxu0  ;;  %v1016_v63 = vpop.f32.mrf.mxu1 }
  0x9f   :  { %v1338_v0 = vmax.f32 %v906_v62, %v1014_v55  ;;  %v2063_v55 = vld [vmem:[%s2685_s0 + $0x110] sm:$0xff] }
  0xa1   :  { %v1339_v1 = vmax.f32 %v1338_v0, %v1121_v50 }
  0xa3   :  { %v1340_v3 = vmax.f32 %v1339_v1, %v1229_v46 }
  0xa5   :  { %v1465_v4 = vadd.f32 %v2321_v2, %v1340_v3  ;;  %v1126_v5 = vpop.f32.mrf.mxu2  ;;  %v1236_v8 = vpop.f32.mrf.mxu3 }
  0xa6   :  { %v909_v9 = vpop.f32.mrf.mxu0  ;;  %v1019_v10 = vpop.f32.mrf.mxu1 }
  0xa7   :  { %v1508_v13 = vmax.f32 %v1465_v4, 0.0  ;;  %v1341_v14 = vmax.f32 %v909_v9, %v1016_v63 }
  0xa9   :  { %1551 = vst [vmem:[%s2687_s3 + $0x18] sm:$0xff] %v1508_v13  ;;  %v1342_v15 = vmax.f32 %v1341_v14, %v1124_v60  ;;  %1953 = vmatmul.msk.bf16.gmra.mxu0 %vm624_vm2, %v2039_v6  ;;  %1975 = vmatmul.msk.bf16.gmra.mxu1 %vm624_vm2, %v2061_v7  ;;  %v2085_v60 = vld [vmem:[%s2685_s0 + $0x1c0] sm:$0xff]  ;;  %v2042_v14 = vld [vmem:[%s2685_s0 + $0x68] sm:$0xff] }
  0xaa   :  { %1997 = vmatmul.msk.bf16.gmra.mxu2 %vm624_vm2, %v2083_v11  ;;  %2019 = vmatmul.msk.bf16.gmra.mxu3 %vm624_vm2, %v2105_v12 }
  0xab   :  { %v1343_v16 = vmax.f32 %v1342_v15, %v1231_v53  ;;  %v2064_v15 = vld [vmem:[%s2685_s0 + $0x118] sm:$0xff] }
  0xad   :  { %v1466_v17 = vadd.f32 %v2321_v2, %v1343_v16  ;;  %v1129_v18 = vpop.f32.mrf.mxu2  ;;  %v1239_v19 = vpop.f32.mrf.mxu3 }
  0xae   :  { %v911_v20 = vpop.f32.mrf.mxu0  ;;  %v1021_v21 = vpop.f32.mrf.mxu1 }
  0xaf   :  { %v1509_v22 = vmax.f32 %v1466_v17, 0.0  ;;  %v1344_v23 = vmax.f32 %v911_v20, %v1019_v10  ;;  %v2108_v20 = vld [vmem:[%s2685_s0 + $0x278] sm:$0xff] }
  0xb1   :  { %1552 = vst [vmem:[%s2687_s3 + $0x20] sm:$0xff] %v1509_v22  ;;  %v1345_v24 = vmax.f32 %v1344_v23, %v1126_v5 }
  0xb3   :  { %v1346_v25 = vmax.f32 %v1345_v24, %v1234_v61  ;;  %v2107_v61 = vld [vmem:[%s2685_s0 + $0x270] sm:$0xff] }
  0xb5   :  { %v1467_v26 = vadd.f32 %v2321_v2, %v1346_v25  ;;  %v1131_v27 = vpop.f32.mrf.mxu2  ;;  %v1241_v30 = vpop.f32.mrf.mxu3 }
  0xb6   :  { %v914_v31 = vpop.f32.mrf.mxu0  ;;  %v1024_v32 = vpop.f32.mrf.mxu1 }
  0xb7   :  { %v1510_v35 = vmax.f32 %v1467_v26, 0.0  ;;  %v1347_v36 = vmax.f32 %v914_v31, %v1021_v21 }
  0xb9   :  { %1553 = vst [vmem:[%s2687_s3 + $0x28] sm:$0xff] %v1510_v35  ;;  %v1348_v37 = vmax.f32 %v1347_v36, %v1129_v18  ;;  %1954 = vmatmul.msk.bf16.gmra.mxu0 %vm624_vm2, %v2040_v28  ;;  %1976 = vmatmul.msk.bf16.gmra.mxu1 %vm624_vm2, %v2062_v29  ;;  %v2043_v36 = vld [vmem:[%s2685_s0 + $0x70] sm:$0xff] }
  0xba   :  { %1998 = vmatmul.msk.bf16.gmra.mxu2 %vm624_vm2, %v2084_v33  ;;  %2020 = vmatmul.msk.bf16.gmra.mxu3 %vm624_vm2, %v2106_v34 }
  0xbb   :  { %v1349_v38 = vmax.f32 %v1348_v37, %v1236_v8  ;;  %v2065_v37 = vld [vmem:[%s2685_s0 + $0x120] sm:$0xff] }
  0xbd   :  { %v1468_v39 = vadd.f32 %v2321_v2, %v1349_v38  ;;  %v1134_v40 = vpop.f32.mrf.mxu2  ;;  %v1244_v43 = vpop.f32.mrf.mxu3 }
  0xbe   :  { %v916_v44 = vpop.f32.mrf.mxu0  ;;  %v1026_v45 = vpop.f32.mrf.mxu1 }
  0xbf   :  { %v1511_v46 = vmax.f32 %v1468_v39, 0.0  ;;  %v1350_v48 = vmax.f32 %v916_v44, %v1024_v32  ;;  %v2109_v44 = vld [vmem:[%s2685_s0 + $0x280] sm:$0xff] }
  0xc1   :  { %1554 = vst [vmem:[%s2687_s3 + $0x30] sm:$0xff] %v1511_v46  ;;  %v1351_v50 = vmax.f32 %v1350_v48, %v1131_v27 }
  0xc3   :  { %v1352_v51 = vmax.f32 %v1351_v50, %v1239_v19  ;;  %v2086_v19 = vld [vmem:[%s2685_s0 + $0x1c8] sm:$0xff] }
  0xc5   :  { %v1469_v52 = vadd.f32 %v2321_v2, %v1352_v51  ;;  %v1136_v53 = vpop.f32.mrf.mxu2  ;;  %v1246_v56 = vpop.f32.mrf.mxu3 }
  0xc6   :  { %v919_v57 = vpop.f32.mrf.mxu0  ;;  %v1029_v58 = vpop.f32.mrf.mxu1 }
  0xc7   :  { %v1512_v62 = vmax.f32 %v1469_v52, 0.0  ;;  %v1353_v63 = vmax.f32 %v919_v57, %v1026_v45 }
  0xc9   :  { %1555 = vst [vmem:[%s2687_s3 + $0x38] sm:$0xff] %v1512_v62  ;;  %v1354_v0 = vmax.f32 %v1353_v63, %v1134_v40  ;;  %1955 = vmatmul.msk.bf16.gmra.mxu0 %vm624_vm2, %v2041_v54  ;;  %1977 = vmatmul.msk.bf16.gmra.mxu1 %vm624_vm2, %v2063_v55  ;;  %v2044_v63 = vld [vmem:[%s2685_s0 + $0x78] sm:$0xff] }
  0xca   :  { %1999 = vmatmul.msk.bf16.gmra.mxu2 %vm624_vm2, %v2085_v60  ;;  %2021 = vmatmul.msk.bf16.gmra.mxu3 %vm624_vm2, %v2107_v61 }
  0xcb   :  { %v1355_v1 = vmax.f32 %v1354_v0, %v1241_v30  ;;  %v2066_v0 = vld [vmem:[%s2685_s0 + $0x128] sm:$0xff] }
  0xcd   :  { %v1470_v3 = vadd.f32 %v2321_v2, %v1355_v1  ;;  %v1139_v4 = vpop.f32.mrf.mxu2  ;;  %v1249_v5 = vpop.f32.mrf.mxu3 }
  0xce   :  { %v921_v6 = vpop.f32.mrf.mxu0  ;;  %v1031_v7 = vpop.f32.mrf.mxu1 }
  0xcf   :  { %v1513_v8 = vmax.f32 %v1470_v3, 0.0  ;;  %v1356_v9 = vmax.f32 %v921_v6, %v1029_v58  ;;  %v2110_v6 = vld [vmem:[%s2685_s0 + $0x288] sm:$0xff] }
  0xd1   :  { %1556 = vst [vmem:[%s2687_s3 + $0x40] sm:$0xff] %v1513_v8  ;;  %v1357_v10 = vmax.f32 %v1356_v9, %v1136_v53 }
  0xd3   :  { %v1358_v11 = vmax.f32 %v1357_v10, %v1244_v43  ;;  %v2087_v43 = vld [vmem:[%s2685_s0 + $0x1d0] sm:$0xff] }
  0xd5   :  { %v1471_v12 = vadd.f32 %v2321_v2, %v1358_v11  ;;  %v1141_v13 = vpop.f32.mrf.mxu2  ;;  %v1251_v16 = vpop.f32.mrf.mxu3 }
  0xd6   :  { %v924_v17 = vpop.f32.mrf.mxu0  ;;  %v1034_v18 = vpop.f32.mrf.mxu1 }
  0xd7   :  { %v1514_v21 = vmax.f32 %v1471_v12, 0.0  ;;  %v1359_v22 = vmax.f32 %v924_v17, %v1031_v7 }
  0xd9   :  { %1557 = vst [vmem:[%s2687_s3 + $0x48] sm:$0xff] %v1514_v21  ;;  %v1360_v23 = vmax.f32 %v1359_v22, %v1139_v4  ;;  %1956 = vmatmul.msk.bf16.gmra.mxu0 %vm624_vm2, %v2042_v14  ;;  %1978 = vmatmul.msk.bf16.gmra.mxu1 %vm624_vm2, %v2064_v15  ;;  %v2045_v22 = vld [vmem:[%s2685_s0 + $0x80] sm:$0xff] }
  0xda   :  { %2000 = vmatmul.msk.bf16.gmra.mxu2 %vm624_vm2, %v2086_v19  ;;  %2022 = vmatmul.msk.bf16.gmra.mxu3 %vm624_vm2, %v2108_v20 }
  0xdb   :  { %v1361_v24 = vmax.f32 %v1360_v23, %v1246_v56  ;;  %v2067_v23 = vld [vmem:[%s2685_s0 + $0x130] sm:$0xff] }
  0xdd   :  { %v1472_v25 = vadd.f32 %v2321_v2, %v1361_v24  ;;  %v1144_v26 = vpop.f32.mrf.mxu2  ;;  %v1254_v27 = vpop.f32.mrf.mxu3 }
  0xde   :  { %v926_v28 = vpop.f32.mrf.mxu0  ;;  %v1036_v29 = vpop.f32.mrf.mxu1 }
  0xdf   :  { %v1515_v30 = vmax.f32 %v1472_v25, 0.0  ;;  %v1362_v31 = vmax.f32 %v926_v28, %v1034_v18  ;;  %v2111_v28 = vld [vmem:[%s2685_s0 + $0x290] sm:$0xff] }
  0xe1   :  { %1558 = vst [vmem:[%s2687_s3 + $0x50] sm:$0xff] %v1515_v30  ;;  %v1363_v32 = vmax.f32 %v1362_v31, %v1141_v13 }
  0xe3   :  { %v1364_v33 = vmax.f32 %v1363_v32, %v1249_v5  ;;  %v2088_v5 = vld [vmem:[%s2685_s0 + $0x1d8] sm:$0xff] }
  0xe5   :  { %v1473_v34 = vadd.f32 %v2321_v2, %v1364_v33  ;;  %v1146_v35 = vpop.f32.mrf.mxu2  ;;  %v1256_v38 = vpop.f32.mrf.mxu3 }
  0xe6   :  { %v929_v39 = vpop.f32.mrf.mxu0  ;;  %v1039_v40 = vpop.f32.mrf.mxu1 }
  0xe7   :  { %v1516_v45 = vmax.f32 %v1473_v34, 0.0  ;;  %v1365_v46 = vmax.f32 %v929_v39, %v1036_v29 }
  0xe9   :  { %1559 = vst [vmem:[%s2687_s3 + $0x58] sm:$0xff] %v1516_v45  ;;  %v1366_v48 = vmax.f32 %v1365_v46, %v1144_v26  ;;  %1957 = vmatmul.msk.bf16.gmra.mxu0 %vm624_vm2, %v2043_v36  ;;  %1979 = vmatmul.msk.bf16.gmra.mxu1 %vm624_vm2, %v2065_v37  ;;  %v2046_v46 = vld [vmem:[%s2685_s0 + $0x88] sm:$0xff] }
  0xea   :  { %2001 = vmatmul.msk.bf16.gmra.mxu2 %vm624_vm2, %v2087_v43  ;;  %2023 = vmatmul.msk.bf16.gmra.mxu3 %vm624_vm2, %v2109_v44 }
  0xeb   :  { %v1367_v50 = vmax.f32 %v1366_v48, %v1251_v16  ;;  %v2068_v48 = vld [vmem:[%s2685_s0 + $0x138] sm:$0xff] }
  0xed   :  { %v1474_v51 = vadd.f32 %v2321_v2, %v1367_v50  ;;  %v1149_v52 = vpop.f32.mrf.mxu2  ;;  %v1259_v53 = vpop.f32.mrf.mxu3 }
  0xee   :  { %v931_v54 = vpop.f32.mrf.mxu0  ;;  %v1041_v55 = vpop.f32.mrf.mxu1 }
  0xef   :  { %v1517_v56 = vmax.f32 %v1474_v51, 0.0  ;;  %v1368_v57 = vmax.f32 %v931_v54, %v1039_v40  ;;  %v2112_v54 = vld [vmem:[%s2685_s0 + $0x298] sm:$0xff] }
  0xf1   :  { %1560 = vst [vmem:[%s2687_s3 + $0x60] sm:$0xff] %v1517_v56  ;;  %v1369_v58 = vmax.f32 %v1368_v57, %v1146_v35 }
  0xf3   :  { %v1370_v60 = vmax.f32 %v1369_v58, %v1254_v27  ;;  %v2089_v27 = vld [vmem:[%s2685_s0 + $0x1e0] sm:$0xff] }
  0xf5   :  { %v1475_v61 = vadd.f32 %v2321_v2, %v1370_v60  ;;  %v1151_v62 = vpop.f32.mrf.mxu2  ;;  %v1261_v1 = vpop.f32.mrf.mxu3 }
  0xf6   :  { %v934_v3 = vpop.f32.mrf.mxu0  ;;  %v1044_v4 = vpop.f32.mrf.mxu1 }
  0xf7   :  { %v1518_v7 = vmax.f32 %v1475_v61, 0.0  ;;  %v1371_v8 = vmax.f32 %v934_v3, %v1041_v55 }
  0xf9   :  { %1561 = vst [vmem:[%s2687_s3 + $0x68] sm:$0xff] %v1518_v7  ;;  %v1372_v9 = vmax.f32 %v1371_v8, %v1149_v52  ;;  %1958 = vmatmul.msk.bf16.gmra.mxu0 %vm624_vm2, %v2044_v63  ;;  %1980 = vmatmul.msk.bf16.gmra.mxu1 %vm624_vm2, %v2066_v0  ;;  %v2047_v8 = vld [vmem:[%s2685_s0 + $0x90] sm:$0xff] }
  0xfa   :  { %2002 = vmatmul.msk.bf16.gmra.mxu2 %vm624_vm2, %v2088_v5  ;;  %2024 = vmatmul.msk.bf16.gmra.mxu3 %vm624_vm2, %v2110_v6 }
  0xfb   :  { %v1373_v10 = vmax.f32 %v1372_v9, %v1256_v38  ;;  %v2069_v9 = vld [vmem:[%s2685_s0 + $0x140] sm:$0xff] }
  0xfd   :  { %v1476_v11 = vadd.f32 %v2321_v2, %v1373_v10  ;;  %v1154_v12 = vpop.f32.mrf.mxu2  ;;  %v1264_v13 = vpop.f32.mrf.mxu3 }
  0xfe   :  { %v936_v14 = vpop.f32.mrf.mxu0  ;;  %v1046_v15 = vpop.f32.mrf.mxu1 }
  0xff   :  { %v1519_v16 = vmax.f32 %v1476_v11, 0.0  ;;  %v1374_v17 = vmax.f32 %v936_v14, %v1044_v4  ;;  %v2113_v14 = vld [vmem:[%s2685_s0 + $0x2a0] sm:$0xff] }
 0x101   :  { %1562 = vst [vmem:[%s2687_s3 + $0x70] sm:$0xff] %v1519_v16  ;;  %v1375_v18 = vmax.f32 %v1374_v17, %v1151_v62 }
 0x103   :  { %v1376_v19 = vmax.f32 %v1375_v18, %v1259_v53  ;;  %v2090_v53 = vld [vmem:[%s2685_s0 + $0x1e8] sm:$0xff] }
 0x105   :  { %v1477_v20 = vadd.f32 %v2321_v2, %v1376_v19  ;;  %v1156_v21 = vpop.f32.mrf.mxu2  ;;  %v1266_v24 = vpop.f32.mrf.mxu3 }
 0x106   :  { %v939_v25 = vpop.f32.mrf.mxu0  ;;  %v1049_v26 = vpop.f32.mrf.mxu1 }
 0x107   :  { %v1520_v29 = vmax.f32 %v1477_v20, 0.0  ;;  %v1377_v30 = vmax.f32 %v939_v25, %v1046_v15 }
 0x109   :  { %1563 = vst [vmem:[%s2687_s3 + $0x78] sm:$0xff] %v1520_v29  ;;  %v1378_v31 = vmax.f32 %v1377_v30, %v1154_v12  ;;  %1959 = vmatmul.msk.bf16.gmra.mxu0 %vm624_vm2, %v2045_v22  ;;  %1981 = vmatmul.msk.bf16.gmra.mxu1 %vm624_vm2, %v2067_v23  ;;  %v2048_v30 = vld [vmem:[%s2685_s0 + $0x98] sm:$0xff] }
 0x10a   :  { %2003 = vmatmul.msk.bf16.gmra.mxu2 %vm624_vm2, %v2089_v27  ;;  %2025 = vmatmul.msk.bf16.gmra.mxu3 %vm624_vm2, %v2111_v28 }
 0x10b   :  { %v1379_v32 = vmax.f32 %v1378_v31, %v1261_v1  ;;  %v2070_v31 = vld [vmem:[%s2685_s0 + $0x148] sm:$0xff] }
 0x10d   :  { %v1478_v33 = vadd.f32 %v2321_v2, %v1379_v32  ;;  %v1159_v34 = vpop.f32.mrf.mxu2  ;;  %v1269_v35 = vpop.f32.mrf.mxu3 }
 0x10e   :  { %v941_v36 = vpop.f32.mrf.mxu0  ;;  %v1051_v37 = vpop.f32.mrf.mxu1 }
 0x10f   :  { %v1521_v38 = vmax.f32 %v1478_v33, 0.0  ;;  %v1380_v39 = vmax.f32 %v941_v36, %v1049_v26  ;;  %v2114_v36 = vld [vmem:[%s2685_s0 + $0x2a8] sm:$0xff] }
 0x111   :  { %1564 = vst [vmem:[%s2687_s3 + $0x80] sm:$0xff] %v1521_v38  ;;  %v1381_v40 = vmax.f32 %v1380_v39, %v1156_v21 }
 0x113   :  { %v1382_v43 = vmax.f32 %v1381_v40, %v1264_v13  ;;  %v2091_v13 = vld [vmem:[%s2685_s0 + $0x1f0] sm:$0xff] }
 0x115   :  { %v1479_v44 = vadd.f32 %v2321_v2, %v1382_v43  ;;  %v1161_v45 = vpop.f32.mrf.mxu2  ;;  %v1271_v50 = vpop.f32.mrf.mxu3 }
 0x116   :  { %v944_v51 = vpop.f32.mrf.mxu0  ;;  %v1054_v52 = vpop.f32.mrf.mxu1 }
 0x117   :  { %v1522_v55 = vmax.f32 %v1479_v44, 0.0  ;;  %v1383_v56 = vmax.f32 %v944_v51, %v1051_v37 }
 0x119   :  { %1565 = vst [vmem:[%s2687_s3 + $0x88] sm:$0xff] %v1522_v55  ;;  %v1384_v57 = vmax.f32 %v1383_v56, %v1159_v34  ;;  %1960 = vmatmul.msk.bf16.gmra.mxu0 %vm624_vm2, %v2046_v46  ;;  %1982 = vmatmul.msk.bf16.gmra.mxu1 %vm624_vm2, %v2068_v48  ;;  %v2049_v56 = vld [vmem:[%s2685_s0 + $0xa0] sm:$0xff] }
 0x11a   :  { %2004 = vmatmul.msk.bf16.gmra.mxu2 %vm624_vm2, %v2090_v53  ;;  %2026 = vmatmul.msk.bf16.gmra.mxu3 %vm624_vm2, %v2112_v54 }
 0x11b   :  { %v1385_v58 = vmax.f32 %v1384_v57, %v1266_v24  ;;  %v2071_v57 = vld [vmem:[%s2685_s0 + $0x150] sm:$0xff] }
 0x11d   :  { %v1480_v60 = vadd.f32 %v2321_v2, %v1385_v58  ;;  %v1164_v61 = vpop.f32.mrf.mxu2  ;;  %v1274_v62 = vpop.f32.mrf.mxu3 }
 0x11e   :  { %v946_v63 = vpop.f32.mrf.mxu0  ;;  %v1056_v0 = vpop.f32.mrf.mxu1 }
 0x11f   :  { %v1523_v1 = vmax.f32 %v1480_v60, 0.0  ;;  %v1386_v3 = vmax.f32 %v946_v63, %v1054_v52 }
 0x121   :  { %1566 = vst [vmem:[%s2687_s3 + $0x90] sm:$0xff] %v1523_v1  ;;  %v1387_v4 = vmax.f32 %v1386_v3, %v1161_v45 }
 0x123   :  { %v1388_v5 = vmax.f32 %v1387_v4, %v1269_v35  ;;  %v2092_v35 = vld [vmem:[%s2685_s0 + $0x1f8] sm:$0xff] }
 0x125   :  { %v1481_v6 = vadd.f32 %v2321_v2, %v1388_v5  ;;  %v1166_v7 = vpop.f32.mrf.mxu2  ;;  %v1276_v10 = vpop.f32.mrf.mxu3 }
 0x126   :  { %v949_v11 = vpop.f32.mrf.mxu0  ;;  %v1059_v12 = vpop.f32.mrf.mxu1 }
 0x127   :  { %v1524_v15 = vmax.f32 %v1481_v6, 0.0  ;;  %v1389_v16 = vmax.f32 %v949_v11, %v1056_v0 }
 0x129   :  { %1567 = vst [vmem:[%s2687_s3 + $0x98] sm:$0xff] %v1524_v15  ;;  %1961 = vmatmul.msk.bf16.gmra.mxu0 %vm624_vm2, %v2047_v8  ;;  %1983 = vmatmul.msk.bf16.gmra.mxu1 %vm624_vm2, %v2069_v9  ;;  %v1390_v17 = vmax.f32 %v1389_v16, %v1164_v61  ;;  %v2050_v15 = vld [vmem:[%s2685_s0 + $0xa8] sm:$0xff]  ;;  %v2072_v16 = vld [vmem:[%s2685_s0 + $0x158] sm:$0xff] }
 0x12a   :  { %2005 = vmatmul.msk.bf16.gmra.mxu2 %vm624_vm2, %v2091_v13  ;;  %2027 = vmatmul.msk.bf16.gmra.mxu3 %vm624_vm2, %v2113_v14 }
 0x12b   :  { %v1391_v18 = vmax.f32 %v1390_v17, %v1271_v50 }
 0x12d   :  { %v1482_v19 = vadd.f32 %v2321_v2, %v1391_v18  ;;  %v1169_v20 = vpop.f32.mrf.mxu2  ;;  %v1279_v21 = vpop.f32.mrf.mxu3 }
 0x12e   :  { %v951_v22 = vpop.f32.mrf.mxu0  ;;  %v1061_v23 = vpop.f32.mrf.mxu1 }
 0x12f   :  { %v1525_v24 = vmax.f32 %v1482_v19, 0.0  ;;  %v1392_v25 = vmax.f32 %v951_v22, %v1059_v12 }
 0x131   :  { %1568 = vst [vmem:[%s2687_s3 + $0xa0] sm:$0xff] %v1525_v24  ;;  %v1393_v26 = vmax.f32 %v1392_v25, %v1166_v7 }
 0x133   :  { %v1394_v27 = vmax.f32 %v1393_v26, %v1274_v62  ;;  %v2093_v62 = vld [vmem:[%s2685_s0 + $0x200] sm:$0xff] }
 0x135   :  { %v1483_v28 = vadd.f32 %v2321_v2, %v1394_v27  ;;  %v1171_v29 = vpop.f32.mrf.mxu2  ;;  %v1281_v32 = vpop.f32.mrf.mxu3 }
 0x136   :  { %v954_v33 = vpop.f32.mrf.mxu0  ;;  %v1064_v34 = vpop.f32.mrf.mxu1 }
 0x137   :  { %v1526_v37 = vmax.f32 %v1483_v28, 0.0  ;;  %v1395_v38 = vmax.f32 %v954_v33, %v1061_v23 }
 0x139   :  { %1569 = vst [vmem:[%s2687_s3 + $0xa8] sm:$0xff] %v1526_v37  ;;  %1962 = vmatmul.msk.bf16.gmra.mxu0 %vm624_vm2, %v2048_v30  ;;  %1984 = vmatmul.msk.bf16.gmra.mxu1 %vm624_vm2, %v2070_v31  ;;  %v1396_v39 = vmax.f32 %v1395_v38, %v1169_v20  ;;  %v2094_v20 = vld [vmem:[%s2685_s0 + $0x208] sm:$0xff] }
 0x13a   :  { %2006 = vmatmul.msk.bf16.gmra.mxu2 %vm624_vm2, %v2092_v35  ;;  %2028 = vmatmul.msk.bf16.gmra.mxu3 %vm624_vm2, %v2114_v36 }
 0x13b   :  { %v1397_v40 = vmax.f32 %v1396_v39, %v1276_v10 }
 0x13d   :  { %v1484_v43 = vadd.f32 %v2321_v2, %v1397_v40  ;;  %v1174_v44 = vpop.f32.mrf.mxu2  ;;  %v1284_v45 = vpop.f32.mrf.mxu3 }
 0x13e   :  { %v956_v46 = vpop.f32.mrf.mxu0  ;;  %v1066_v48 = vpop.f32.mrf.mxu1 }
 0x13f   :  { %v1527_v50 = vmax.f32 %v1484_v43, 0.0  ;;  %v1398_v51 = vmax.f32 %v956_v46, %v1064_v34 }
 0x141   :  { %1570 = vst [vmem:[%s2687_s3 + $0xb0] sm:$0xff] %v1527_v50  ;;  %v1399_v52 = vmax.f32 %v1398_v51, %v1171_v29 }
 0x143   :  { %v1400_v53 = vmax.f32 %v1399_v52, %v1279_v21 }
 0x145   :  { %v1485_v54 = vadd.f32 %v2321_v2, %v1400_v53  ;;  %v1176_v55 = vpop.f32.mrf.mxu2  ;;  %v1286_v58 = vpop.f32.mrf.mxu3 }
 0x146   :  { %v959_v60 = vpop.f32.mrf.mxu0  ;;  %v1069_v61 = vpop.f32.mrf.mxu1 }
 0x147   :  { %v1528_v63 = vmax.f32 %v1485_v54, 0.0  ;;  %v1401_v0 = vmax.f32 %v959_v60, %v1066_v48 }
 0x149   :  { %1571 = vst [vmem:[%s2687_s3 + $0xb8] sm:$0xff] %v1528_v63  ;;  %1963 = vmatmul.msk.bf16.gmra.mxu0 %vm624_vm2, %v2049_v56  ;;  %1985 = vmatmul.msk.bf16.gmra.mxu1 %vm624_vm2, %v2071_v57  ;;  %v1402_v1 = vmax.f32 %v1401_v0, %v1174_v44 }
 0x14a   :  { %2007 = vmatmul.msk.bf16.gmra.mxu2 %vm624_vm2, %v2093_v62 }
 0x14b   :  { %v1403_v3 = vmax.f32 %v1402_v1, %v1281_v32 }
 0x14d   :  { %v1486_v4 = vadd.f32 %v2321_v2, %v1403_v3  ;;  %v1179_v5 = vpop.f32.mrf.mxu2  ;;  %v1289_v6 = vpop.f32.mrf.mxu3 }
 0x14e   :  { %v961_v7 = vpop.f32.mrf.mxu0  ;;  %v1071_v8 = vpop.f32.mrf.mxu1 }
 0x14f   :  { %v1529_v9 = vmax.f32 %v1486_v4, 0.0  ;;  %v1404_v10 = vmax.f32 %v961_v7, %v1069_v61 }
 0x151   :  { %1572 = vst [vmem:[%s2687_s3 + $0xc0] sm:$0xff] %v1529_v9  ;;  %v1405_v11 = vmax.f32 %v1404_v10, %v1176_v55 }
 0x153   :  { %v1406_v12 = vmax.f32 %v1405_v11, %v1284_v45 }
 0x155   :  { %v1487_v13 = vadd.f32 %v2321_v2, %v1406_v12  ;;  %v1181_v14 = vpop.f32.mrf.mxu2  ;;  %v1291_v17 = vpop.f32.mrf.mxu3 }
 0x156   :  { %v964_v18 = vpop.f32.mrf.mxu0  ;;  %v1074_v19 = vpop.f32.mrf.mxu1 }
 0x157   :  { %v1530_v21 = vmax.f32 %v1487_v13, 0.0  ;;  %v1407_v22 = vmax.f32 %v964_v18, %v1071_v8 }
 0x159   :  { %1573 = vst [vmem:[%s2687_s3 + $0xc8] sm:$0xff] %v1530_v21  ;;  %1964 = vmatmul.msk.bf16.gmra.mxu0 %vm624_vm2, %v2050_v15  ;;  %1986 = vmatmul.msk.bf16.gmra.mxu1 %vm624_vm2, %v2072_v16  ;;  %v1408_v23 = vmax.f32 %v1407_v22, %v1179_v5 }
 0x15a   :  { %2008 = vmatmul.msk.bf16.gmra.mxu2 %vm624_vm2, %v2094_v20 }
 0x15b   :  { %v1409_v24 = vmax.f32 %v1408_v23, %v1286_v58 }
 0x15d   :  { %v1488_v25 = vadd.f32 %v2321_v2, %v1409_v24  ;;  %v1184_v26 = vpop.f32.mrf.mxu2  ;;  %v1294_v27 = vpop.f32.mrf.mxu3 }
 0x15e   :  { %v966_v28 = vpop.f32.mrf.mxu0  ;;  %v1076_v29 = vpop.f32.mrf.mxu1 }
 0x15f   :  { %v1531_v30 = vmax.f32 %v1488_v25, 0.0  ;;  %v1410_v31 = vmax.f32 %v966_v28, %v1074_v19 }
 0x161   :  { %1574 = vst [vmem:[%s2687_s3 + $0xd0] sm:$0xff] %v1531_v30  ;;  %v1411_v32 = vmax.f32 %v1410_v31, %v1181_v14 }
 0x163   :  { %v1412_v33 = vmax.f32 %v1411_v32, %v1289_v6 }
 0x165   :  { %v1489_v34 = vadd.f32 %v2321_v2, %v1412_v33  ;;  %v1186_v35 = vpop.f32.mrf.mxu2  ;;  %v1296_v36 = vpop.f32.mrf.mxu3 }
 0x166   :  { %v969_v37 = vpop.f32.mrf.mxu0  ;;  %v1079_v38 = vpop.f32.mrf.mxu1 }
 0x167   :  { %v1532_v39 = vmax.f32 %v1489_v34, 0.0  ;;  %v1413_v40 = vmax.f32 %v969_v37, %v1076_v29 }
 0x169   :  { %1575 = vst [vmem:[%s2687_s3 + $0xd8] sm:$0xff] %v1532_v39  ;;  %v1414_v43 = vmax.f32 %v1413_v40, %v1184_v26 }
 0x16b   :  { %v1415_v44 = vmax.f32 %v1414_v43, %v1291_v17 }
 0x16d   :  { %v1490_v45 = vadd.f32 %v2321_v2, %v1415_v44  ;;  %v1189_v46 = vpop.f32.mrf.mxu2  ;;  %v1299_v48 = vpop.f32.mrf.mxu3 }
 0x16e   :  { %v971_v50 = vpop.f32.mrf.mxu0  ;;  %v1081_v51 = vpop.f32.mrf.mxu1 }
 0x16f   :  { %v1533_v52 = vmax.f32 %v1490_v45, 0.0  ;;  %v1416_v53 = vmax.f32 %v971_v50, %v1079_v38 }
 0x171   :  { %1576 = vst [vmem:[%s2687_s3 + $0xe0] sm:$0xff] %v1533_v52  ;;  %v1417_v54 = vmax.f32 %v1416_v53, %v1186_v35 }
 0x173   :  { %v1418_v55 = vmax.f32 %v1417_v54, %v1294_v27 }
 0x175   :  { %v1491_v56 = vadd.f32 %v2321_v2, %v1418_v55  ;;  %v1191_v57 = vpop.f32.mrf.mxu2  ;;  %v1301_v58 = vpop.f32.mrf.mxu3 }
 0x176   :  { %v974_v60 = vpop.f32.mrf.mxu0  ;;  %v1084_v61 = vpop.f32.mrf.mxu1 }
 0x177   :  { %v1534_v62 = vmax.f32 %v1491_v56, 0.0  ;;  %v1419_v63 = vmax.f32 %v974_v60, %v1081_v51 }
 0x179   :  { %1577 = vst [vmem:[%s2687_s3 + $0xe8] sm:$0xff] %v1534_v62  ;;  %v1420_v0 = vmax.f32 %v1419_v63, %v1189_v46 }
 0x17b   :  { %v1421_v1 = vmax.f32 %v1420_v0, %v1296_v36 }
 0x17d   :  { %v1492_v3 = vadd.f32 %v2321_v2, %v1421_v1  ;;  %v1194_v4 = vpop.f32.mrf.mxu2  ;;  %v1304_v5 = vpop.f32.mrf.mxu3 }
 0x17e   :  { %v976_v6 = vpop.f32.mrf.mxu0  ;;  %v1086_v7 = vpop.f32.mrf.mxu1 }
 0x17f   :  { %v1535_v8 = vmax.f32 %v1492_v3, 0.0  ;;  %v1422_v9 = vmax.f32 %v976_v6, %v1084_v61 }
 0x181   :  { %1578 = vst [vmem:[%s2687_s3 + $0xf0] sm:$0xff] %v1535_v8  ;;  %v1423_v10 = vmax.f32 %v1422_v9, %v1191_v57 }
 0x183   :  { %v1424_v11 = vmax.f32 %v1423_v10, %v1299_v48 }
 0x185   :  { %v1493_v12 = vadd.f32 %v2321_v2, %v1424_v11  ;;  %v1196_v13 = vpop.f32.mrf.mxu2  ;;  %v1306_v18 = vpop.f32.mrf.mxu3 }
 0x186   :  { %v979_v14 = vpop.f32.mrf.mxu0  ;;  %v1089_v15 = vpop.f32.mrf.mxu1 }
 0x187   :  { %v1536_v16 = vmax.f32 %v1493_v12, 0.0  ;;  %v1425_v17 = vmax.f32 %v979_v14, %v1086_v7 }
 0x189   :  { %1579 = vst [vmem:[%s2687_s3 + $0xf8] sm:$0xff] %v1536_v16  ;;  %v1426_v19 = vmax.f32 %v1425_v17, %v1194_v4 }
 0x18b   :  { %v1427_v20 = vmax.f32 %v1426_v19, %v1301_v58 }
 0x18d   :  { %v1494_v21 = vadd.f32 %v2321_v2, %v1427_v20  ;;  %v1199_v22 = vpop.f32.mrf.mxu2  ;;  %v1309_v28 = vpop.f32.mrf.mxu3 }
 0x18e   :  { %v981_v23 = vpop.f32.mrf.mxu0  ;;  %v1091_v24 = vpop.f32.mrf.mxu1 }
 0x18f   :  { %v1537_v25 = vmax.f32 %v1494_v21, 0.0  ;;  %v1428_v26 = vmax.f32 %v981_v23, %v1089_v15 }
 0x191   :  { %1580 = vst [vmem:[%s2687_s3 + $0x100] sm:$0xff] %v1537_v25  ;;  %v1429_v27 = vmax.f32 %v1428_v26, %v1196_v13 }
 0x193   :  { %v1430_v29 = vmax.f32 %v1429_v27, %v1304_v5 }
 0x195   :  { %v1495_v30 = vadd.f32 %v2321_v2, %v1430_v29  ;;  %v1201_v31 = vpop.f32.mrf.mxu2  ;;  %v1311_v38 = vpop.f32.mrf.mxu3 }
 0x196   :  { %v984_v32 = vpop.f32.mrf.mxu0  ;;  %v1094_v33 = vpop.f32.mrf.mxu1 }
 0x197   :  { %v1538_v34 = vmax.f32 %v1495_v30, 0.0  ;;  %v1431_v35 = vmax.f32 %v984_v32, %v1091_v24 }
 0x199   :  { %1581 = vst [vmem:[%s2687_s3 + $0x108] sm:$0xff] %v1538_v34  ;;  %v1432_v36 = vmax.f32 %v1431_v35, %v1199_v22 }
 0x19b   :  { %v1433_v37 = vmax.f32 %v1432_v36, %v1306_v18 }
 0x19d   :  { %v1496_v39 = vadd.f32 %v2321_v2, %v1433_v37  ;;  %v1204_v40 = vpop.f32.mrf.mxu2  ;;  %v1314_v53 = vpop.f32.mrf.mxu3 }
 0x19e   :  { %v986_v43 = vpop.f32.mrf.mxu0  ;;  %v1096_v44 = vpop.f32.mrf.mxu1 }
 0x19f   :  { %v1539_v45 = vmax.f32 %v1496_v39, 0.0  ;;  %v1434_v46 = vmax.f32 %v986_v43, %v1094_v33 }
 0x1a1   :  { %1582 = vst [vmem:[%s2687_s3 + $0x110] sm:$0xff] %v1539_v45  ;;  %v1435_v48 = vmax.f32 %v1434_v46, %v1201_v31 }
 0x1a3   :  { %v1436_v50 = vmax.f32 %v1435_v48, %v1309_v28 }
 0x1a5   :  { %v1497_v51 = vadd.f32 %v2321_v2, %v1436_v50  ;;  %v1206_v52 = vpop.f32.mrf.mxu2  ;;  %v1316_v4 = vpop.f32.mrf.mxu3 }
 0x1a6   :  { %v989_v54 = vpop.f32.mrf.mxu0  ;;  %v1099_v55 = vpop.f32.mrf.mxu1 }
 0x1a7   :  { %v1540_v56 = vmax.f32 %v1497_v51, 0.0  ;;  %v1437_v57 = vmax.f32 %v989_v54, %v1096_v44 }
 0x1a9   :  { %1583 = vst [vmem:[%s2687_s3 + $0x118] sm:$0xff] %v1540_v56  ;;  %v1438_v58 = vmax.f32 %v1437_v57, %v1204_v40 }
 0x1ab   :  { %v1439_v60 = vmax.f32 %v1438_v58, %v1311_v38 }
 0x1ad   :  { %v1498_v61 = vadd.f32 %v2321_v2, %v1439_v60  ;;  %v1209_v62 = vpop.f32.mrf.mxu2  ;;  %v1319_v14 = vpop.f32.mrf.mxu3 }
 0x1ae   :  { %v991_v63 = vpop.f32.mrf.mxu0  ;;  %v1101_v0 = vpop.f32.mrf.mxu1 }
 0x1af   :  { %v1541_v1 = vmax.f32 %v1498_v61, 0.0  ;;  %v1440_v3 = vmax.f32 %v991_v63, %v1099_v55 }
 0x1b1   :  { %1584 = vst [vmem:[%s2687_s3 + $0x120] sm:$0xff] %v1541_v1  ;;  %v1441_v5 = vmax.f32 %v1440_v3, %v1206_v52 }
 0x1b3   :  { %v1442_v6 = vmax.f32 %v1441_v5, %v1314_v53 }
 0x1b5   :  { %v1499_v7 = vadd.f32 %v2321_v2, %v1442_v6  ;;  %v1211_v8 = vpop.f32.mrf.mxu2  ;;  %v1321_v24 = vpop.f32.mrf.mxu3 }
 0x1b6   :  { %v994_v9 = vpop.f32.mrf.mxu0  ;;  %v1104_v10 = vpop.f32.mrf.mxu1 }
 0x1b7   :  { %v1542_v11 = vmax.f32 %v1499_v7, 0.0  ;;  %v1443_v12 = vmax.f32 %v994_v9, %v1101_v0 }
 0x1b9   :  { %1585 = vst [vmem:[%s2687_s3 + $0x128] sm:$0xff] %v1542_v11  ;;  %v1444_v13 = vmax.f32 %v1443_v12, %v1209_v62 }
 0x1bb   :  { %v1445_v15 = vmax.f32 %v1444_v13, %v1316_v4 }
 0x1bd   :  { %v1500_v16 = vadd.f32 %v2321_v2, %v1445_v15  ;;  %v1214_v17 = vpop.f32.mrf.mxu2  ;;  %v1324_v35 = vpop.f32.mrf.mxu3 }
 0x1be   :  { %v996_v18 = vpop.f32.mrf.mxu0  ;;  %v1106_v19 = vpop.f32.mrf.mxu1 }
 0x1bf   :  { %v1543_v20 = vmax.f32 %v1500_v16, 0.0  ;;  %v1446_v21 = vmax.f32 %v996_v18, %v1104_v10 }
 0x1c1   :  { %1586 = vst [vmem:[%s2687_s3 + $0x130] sm:$0xff] %v1543_v20  ;;  %v1447_v22 = vmax.f32 %v1446_v21, %v1211_v8 }
 0x1c3   :  { %v1448_v23 = vmax.f32 %v1447_v22, %v1319_v14 }
 0x1c5   :  { %v1501_v25 = vadd.f32 %v2321_v2, %v1448_v23  ;;  %v1216_v26 = vpop.f32.mrf.mxu2  ;;  %v1326_v52 = vpop.f32.mrf.mxu3 }
 0x1c6   :  { %v999_v27 = vpop.f32.mrf.mxu0  ;;  %v1109_v28 = vpop.f32.mrf.mxu1 }
 0x1c7   :  { %v1544_v29 = vmax.f32 %v1501_v25, 0.0  ;;  %v1449_v30 = vmax.f32 %v999_v27, %v1106_v19 }
 0x1c9   :  { %1587 = vst [vmem:[%s2687_s3 + $0x138] sm:$0xff] %v1544_v29  ;;  %v1450_v31 = vmax.f32 %v1449_v30, %v1214_v17 }
 0x1cb   :  { %v1451_v32 = vmax.f32 %v1450_v31, %v1321_v24 }
 0x1cd   :  { %v1502_v33 = vadd.f32 %v2321_v2, %v1451_v32  ;;  %v1219_v34 = vpop.f32.mrf.mxu2 }
 0x1ce   :  { %v1001_v36 = vpop.f32.mrf.mxu0  ;;  %v1111_v37 = vpop.f32.mrf.mxu1 }
 0x1cf   :  { %v1545_v38 = vmax.f32 %v1502_v33, 0.0  ;;  %v1452_v39 = vmax.f32 %v1001_v36, %v1109_v28 }
 0x1d1   :  { %1588 = vst [vmem:[%s2687_s3 + $0x140] sm:$0xff] %v1545_v38  ;;  %v1453_v40 = vmax.f32 %v1452_v39, %v1216_v26 }
 0x1d3   :  { %v1454_v43 = vmax.f32 %v1453_v40, %v1324_v35 }
 0x1d5   :  { %v1503_v44 = vadd.f32 %v2321_v2, %v1454_v43  ;;  %v1221_v45 = vpop.f32.mrf.mxu2 }
 0x1d6   :  { %v1004_v46 = vpop.f32.mrf.mxu0  ;;  %v1114_v48 = vpop.f32.mrf.mxu1 }
 0x1d7   :  { %v1546_v50 = vmax.f32 %v1503_v44, 0.0  ;;  %v1455_v51 = vmax.f32 %v1004_v46, %v1111_v37 }
 0x1d9   :  { %1589 = vst [vmem:[%s2687_s3 + $0x148] sm:$0xff] %v1546_v50  ;;  %v1456_v53 = vmax.f32 %v1455_v51, %v1219_v34 }
 0x1db   :  { %v1457_v54 = vmax.f32 %v1456_v53, %v1326_v52 }
 0x1dd   :  { %v1504_v55 = vadd.f32 %v2321_v2, %v1457_v54  ;;  %v1224_v56 = vpop.f32.mrf.mxu2 }
 0x1de   :  { %v1006_v57 = vpop.f32.mrf.mxu0  ;;  %v1116_v58 = vpop.f32.mrf.mxu1 }
 0x1df   :  { %v1547_v60 = vmax.f32 %v1504_v55, 0.0  ;;  %v1329_v61 = vmax.f32 %v2282_v41, %v1006_v57  ;;  %v1333_v62 = vmax.f32 %v1332_v49, %v1116_v58 }
 0x1e1   :  { %1590 = vst [vmem:[%s2687_s3 + $0x150] sm:$0xff] %v1547_v60  ;;  %v1330_v63 = vmax.f32 %v1329_v61, %v1114_v48  ;;  %v1334_v0 = vmax.f32 %v1333_v62, %v1224_v56 }
 0x1e3   :  { %v1331_v1 = vmax.f32 %v1330_v63, %v1221_v45  ;;  %v1463_v3 = vadd.f32 %v2321_v2, %v1334_v0 }
 0x1e5   :  { %v1462_v4 = vadd.f32 %v2321_v2, %v1331_v1  ;;  %v1506_v5 = vmax.f32 %v1463_v3, 0.0  ;;  %v1226_v6 = vpop.f32.mrf.mxu2 }
 0x1e6   :  { %v1337_v7 = vmax.f32 %v2314_v59, %v1226_v6 }
 0x1e7   :  { %v1505_v41 = vmax.f32 %v1462_v4, 0.0  ;;  %1549 = vst [vmem:[%s2687_s3 + $0x8] sm:$0xff] %v1506_v5 }
 0x1e8   :  { %v1464_v42 = vadd.f32 %v2321_v2, %v1337_v7 }
 0x1e9   :  { %1548 = vst [vmem:[%s2687_s3] sm:$0xff] %v1505_v41 }
 0x1ea   :  { %v1507_v47 = vmax.f32 %v1464_v42, 0.0 }
 0x1ec   :  { %1550 = vst [vmem:[%s2687_s3 + $0x10] sm:$0xff] %v1507_v47 }

// kernel: basic_cnn_forward.4
= control target key start
LH: loop header
LB: loop body
LE: loop exit
PB: predicated region body
PF: predicated region fallthrough
CT: control target
= control target key end

     0   :  { %vm425_vm0 = vcmask 261120   ;;  %s1532_s1 = inlined_call_operand.vmem [shape: bf16[288,128], index: 1, kind: input, shape index: {}]   ;;  %s1533_s0 = inlined_call_operand.vmem [shape: bf16[4,56,288], index: 0, kind: input, shape index: {}]   ;;  %s1534_s2 = inlined_call_operand.vmem [shape: f32[1,128], index: 2, kind: input, shape index: {}]   ;;  %s1535_s3 = inlined_call_operand.vmem [shape: f32[56,128], index: 3, kind: output, shape index: {}]  }
   0x1   :  { %v1058_v0 = vld [vmem:[%s1532_s1 + $0x38] sm:$0xff]  ;;  %v1117_v2 = vld [vmem:[%s1532_s1 + $0x88] sm:$0xff]  ;;  %v1057_v3 = vld [vmem:[%s1532_s1 + $0x30] sm:$0xff] }
   0x2   :  { %v1066_v1 = vld [vmem:[%s1532_s1 + $0x78] sm:$0xff]  ;;  %468 = vmatpush.bf16.msra.mxu0 %v1058_v0  ;;  %1069 = vmatpush.bf16.msra.mxu3 %v1058_v0  ;;  %v1065_v4 = vld [vmem:[%s1532_s1 + $0x70] sm:$0xff]  ;;  %v1129_v5 = vld [vmem:[%s1532_s1 + $0x80] sm:$0xff] }
   0x3   :  { %547 = vmatpush.bf16.msra.mxu1 %v1066_v1  ;;  %632 = vmatpush.bf16.msra.mxu2 %v1117_v2  ;;  %v765_v6 = vld [vmem:[%s1533_s0 + $0x8] sm:$0xf]  ;;  %v1011_v7 = vld [vmem:[%s1533_s0 + $0x10] sm:$0xf0]  ;;  %v1055_v11 = vld [vmem:[%s1532_s1 + $0x20] sm:$0xff] }
   0x4   :  { %v766_v8 = vor.u32 %v1011_v7, %v765_v6  ;;  %v1056_v9 = vld [vmem:[%s1532_s1 + $0x28] sm:$0xff]  ;;  %v1063_v12 = vld [vmem:[%s1532_s1 + $0x60] sm:$0xff]  ;;  %v1054_v13 = vld [vmem:[%s1532_s1 + $0x18] sm:$0xff] }
   0x5   :  { %v1064_v10 = vld [vmem:[%s1532_s1 + $0x68] sm:$0xff]  ;;  %v1062_v14 = vld [vmem:[%s1532_s1 + $0x58] sm:$0xff]  ;;  %v1053_v15 = vld [vmem:[%s1532_s1 + $0x10] sm:$0xff] }
   0x6   :  { %469 = vmatpush.bf16.msra.mxu0 %v1057_v3  ;;  %1070 = vmatpush.bf16.msra.mxu3 %v1057_v3  ;;  %v1061_v16 = vld [vmem:[%s1532_s1 + $0x50] sm:$0xff]  ;;  %v777_v17 = vld [vmem:[%s1533_s0 + $0x20] sm:$0xf]  ;;  %v1014_v18 = vld [vmem:[%s1533_s0 + $0x28] sm:$0xf0] }
   0x7   :  { %548 = vmatpush.bf16.msra.mxu1 %v1065_v4  ;;  %633 = vmatpush.bf16.msra.mxu2 %v1129_v5  ;;  %v778_v19 = vor.u32 %v1014_v18, %v777_v17  ;;  %v1052_v20 = vld [vmem:[%s1532_s1 + $0x8] sm:$0xff]  ;;  %v1051_v22 = vld [vmem:[%s1532_s1] sm:$0xff]  ;;  %v1043_v27 = vld [vmem:[%s1533_s0 + $0x110] sm:$0xf0] }
   0x8   :  { %v1060_v21 = vld [vmem:[%s1532_s1 + $0x48] sm:$0xff]  ;;  %v1059_v23 = vld [vmem:[%s1532_s1 + $0x40] sm:$0xff]  ;;  %v759_v29 = vld [vmem:[%s1533_s0 + $0xc] sm:$0xf0] }
   0x9   :  { %v757_v24 = vld [vmem:[%s1533_s0] sm:$0xf]  ;;  %v1010_v25 = vld [vmem:[%s1533_s0 + $0x8] sm:$0xf0]  ;;  %v889_v26 = vld [vmem:[%s1533_s0 + $0x108] sm:$0xf] }
   0xa   :  { %995 = vmatmul.msk.bf16.vlgmr.msra.gmra.mxu2 %vm425_vm0, %v766_v8  ;;  %470 = vmatpush.bf16.msra.mxu0 %v1056_v9  ;;  %v1009_v28 = vld [vmem:[%s1533_s0 + $0x4] sm:$0xf]  ;;  %v758_v30 = vor.u32 %v1010_v25, %v757_v24  ;;  %v890_v31 = vor.u32 %v1043_v27, %v889_v26  ;;  %v789_v33 = vld [vmem:[%s1533_s0 + $0x38] sm:$0xf]  ;;  %v901_v38 = vld [vmem:[%s1533_s0 + $0x120] sm:$0xf] }
   0xb   :  { %1071 = vmatpush.bf16.msra.mxu3 %v1056_v9  ;;  %549 = vmatpush.bf16.msra.mxu1 %v1064_v10  ;;  %v762_v32 = vor.u32 %v1009_v28, %v759_v29  ;;  %v1017_v34 = vld [vmem:[%s1533_s0 + $0x40] sm:$0xf0]  ;;  %v769_v36 = vld [vmem:[%s1533_s0 + $0x18] sm:$0xf]  ;;  %v1046_v39 = vld [vmem:[%s1533_s0 + $0x128] sm:$0xf0] }
   0xc   :  { %v790_v35 = vor.u32 %v1017_v34, %v789_v33  ;;  %v1013_v37 = vld [vmem:[%s1533_s0 + $0x20] sm:$0xf0]  ;;  %v1012_v40 = vld [vmem:[%s1533_s0 + $0x1c] sm:$0xf]  ;;  %v771_v41 = vld [vmem:[%s1533_s0 + $0x24] sm:$0xf0]  ;;  %v902_v43 = vor.u32 %v1046_v39, %v901_v38 }
   0xd   :  { %v770_v42 = vor.u32 %v1013_v37, %v769_v36  ;;  %v774_v44 = vor.u32 %v1012_v40, %v771_v41  ;;  %v801_v45 = vld [vmem:[%s1533_s0 + $0x50] sm:$0xf]  ;;  %v1020_v46 = vld [vmem:[%s1533_s0 + $0x58] sm:$0xf0]  ;;  %v913_v50 = vld [vmem:[%s1533_s0 + $0x138] sm:$0xf] }
   0xe   :  { %471 = vmatpush.bf16.msra.mxu0 %v1055_v11  ;;  %v802_v47 = vor.u32 %v1020_v46, %v801_v45  ;;  %v781_v48 = vld [vmem:[%s1533_s0 + $0x30] sm:$0xf]  ;;  %v1016_v49 = vld [vmem:[%s1533_s0 + $0x38] sm:$0xf0]  ;;  %v1049_v51 = vld [vmem:[%s1533_s0 + $0x140] sm:$0xf0] }
   0xf   :  { %1072 = vmatpush.bf16.msra.mxu3 %v1055_v11  ;;  %550 = vmatpush.bf16.msra.mxu1 %v1063_v12  ;;  %v1015_v52 = vld [vmem:[%s1533_s0 + $0x34] sm:$0xf]  ;;  %v783_v53 = vld [vmem:[%s1533_s0 + $0x3c] sm:$0xf0]  ;;  %v782_v54 = vor.u32 %v1016_v49, %v781_v48  ;;  %v914_v55 = vor.u32 %v1049_v51, %v913_v50  ;;  %v813_v57 = vld [vmem:[%s1533_s0 + $0x68] sm:$0xf] }
  0x10   :  { %v786_v56 = vor.u32 %v1015_v52, %v783_v53  ;;  %v1023_v58 = vld [vmem:[%s1533_s0 + $0x70] sm:$0xf0]  ;;  %v793_v60 = vld [vmem:[%s1533_s0 + $0x48] sm:$0xf]  ;;  %v1018_v62 = vld [vmem:[%s1533_s0 + $0x4c] sm:$0xf] }
  0x11   :  { %v814_v59 = vor.u32 %v1023_v58, %v813_v57  ;;  %v1019_v61 = vld [vmem:[%s1533_s0 + $0x50] sm:$0xf0]  ;;  %v795_v63 = vld [vmem:[%s1533_s0 + $0x54] sm:$0xf0]  ;;  %v1042_v0 = vld [vmem:[%s1533_s0 + $0x10c] sm:$0xf] }
  0x12   :  { %472 = vmatpush.bf16.msra.mxu0 %v1054_v13  ;;  %v798_v3 = vor.u32 %v1018_v62, %v795_v63  ;;  %v1026_v6 = vld [vmem:[%s1533_s0 + $0x88] sm:$0xf0]  ;;  %v805_v8 = vld [vmem:[%s1533_s0 + $0x60] sm:$0xf]  ;;  %v807_v11 = vld [vmem:[%s1533_s0 + $0x6c] sm:$0xf0] }
  0x13   :  { %1073 = vmatpush.bf16.msra.mxu3 %v1054_v13  ;;  %551 = vmatpush.bf16.msra.mxu1 %v1062_v14  ;;  %v1022_v9 = vld [vmem:[%s1533_s0 + $0x68] sm:$0xf0]  ;;  %v903_v13 = vld [vmem:[%s1533_s0 + $0x12c] sm:$0xf0]  ;;  %v837_v17 = vld [vmem:[%s1533_s0 + $0x98] sm:$0xf] }
  0x14   :  { %v1029_v18 = vld [vmem:[%s1533_s0 + $0xa0] sm:$0xf0]  ;;  %v1048_v24 = vld [vmem:[%s1533_s0 + $0x13c] sm:$0xf]  ;;  %v915_v25 = vld [vmem:[%s1533_s0 + $0x144] sm:$0xf0] }
  0x15   :  { %v918_v28 = vor.u32 %v1048_v24, %v915_v25  ;;  %v849_v29 = vld [vmem:[%s1533_s0 + $0xb0] sm:$0xf]  ;;  %v1028_v33 = vld [vmem:[%s1533_s0 + $0x98] sm:$0xf0]  ;;  %v1027_v34 = vld [vmem:[%s1533_s0 + $0x94] sm:$0xf] }
  0x16   :  { %473 = vmatpush.bf16.msra.mxu0 %v1053_v15  ;;  %v909_v36 = vld [vmem:[%s1533_s0 + $0x128] sm:$0xf]  ;;  %v1047_v37 = vld [vmem:[%s1533_s0 + $0x130] sm:$0xf0]  ;;  %v1030_v46 = vld [vmem:[%s1533_s0 + $0xac] sm:$0xf] }
  0x17   :  { %1074 = vmatpush.bf16.msra.mxu3 %v1053_v15  ;;  %552 = vmatpush.bf16.msra.mxu1 %v1061_v16  ;;  %v910_v40 = vor.u32 %v1047_v37, %v909_v36  ;;  %v861_v41 = vld [vmem:[%s1533_s0 + $0xc8] sm:$0xf]  ;;  %v1031_v45 = vld [vmem:[%s1533_s0 + $0xb0] sm:$0xf0]  ;;  %v921_v48 = vld [vmem:[%s1533_s0 + $0x140] sm:$0xf] }
  0x18   :  { %v1050_v49 = vld [vmem:[%s1533_s0 + $0x148] sm:$0xf0]  ;;  %v853_v58 = vld [vmem:[%s1533_s0 + $0xc0] sm:$0xf]  ;;  %v1040_v36 = vld [vmem:[%s1533_s0 + $0xf8] sm:$0xf0] }
  0x19   :  { %v922_v53 = vor.u32 %v1050_v49, %v921_v48  ;;  %v1039_v37 = vld [vmem:[%s1533_s0 + $0xf4] sm:$0xf] }
  0x1a   :  { %996 = vmatmul.msk.bf16.gmra.mxu2 %vm425_vm0, %v778_v19  ;;  %474 = vmatpush.bf16.msra.mxu0 %v1052_v20  ;;  %v838_v19 = vor.u32 %v1029_v18, %v837_v17  ;;  %v867_v17 = vld [vmem:[%s1533_s0 + $0xe4] sm:$0xf0] }
  0x1b   :  { %1075 = vmatpush.bf16.msra.mxu3 %v1052_v20  ;;  %553 = vmatpush.bf16.msra.mxu1 %v1060_v21  ;;  %v817_v20 = vld [vmem:[%s1533_s0 + $0x78] sm:$0xf] }
  0x1e   :  { %475 = vmatpush.bf16.msra.mxu0 %v1051_v22 }
  0x1f   :  { %1076 = vmatpush.bf16.msra.mxu3 %v1051_v22  ;;  %554 = vmatpush.bf16.msra.mxu1 %v1059_v23  ;;  %v1024_v22 = vld [vmem:[%s1533_s0 + $0x7c] sm:$0xf] }
  0x21   :  { %476 = vmatmul.bf16.vlgmr.msra.gmra.mxu0 %v758_v30  ;;  %v1032_v30 = vld [vmem:[%s1533_s0 + $0xb8] sm:$0xf0] }
  0x22   :  { %531 = vmatmul.bf16.vlgmr.msra.gmra.mxu3 %v890_v31  ;;  %555 = vmatmul.bf16.vlgmr.msra.gmra.mxu1 %v762_v32  ;;  %v850_v31 = vor.u32 %v1032_v30, %v849_v29  ;;  %v829_v32 = vld [vmem:[%s1533_s0 + $0x90] sm:$0xf] }
  0x23   :  { %1077 = vmatpush.bf16.msrb.mxu3 %v1066_v1  ;;  %v891_v1 = vld [vmem:[%s1533_s0 + $0x114] sm:$0xf0]  ;;  %v830_v38 = vor.u32 %v1028_v33, %v829_v32 }
  0x27   :  { %1078 = vmatpush.bf16.msrb.mxu3 %v1065_v4  ;;  %v894_v4 = vor.u32 %v1042_v0, %v891_v1 }
  0x2a   :  { %997 = vmatmul.msk.bf16.gmra.mxu2 %vm425_vm0, %v790_v35  ;;  %v831_v35 = vld [vmem:[%s1533_s0 + $0x9c] sm:$0xf0] }
  0x2b   :  { %1079 = vmatpush.bf16.msrb.mxu3 %v1064_v10  ;;  %v1021_v10 = vld [vmem:[%s1533_s0 + $0x64] sm:$0xf]  ;;  %v834_v39 = vor.u32 %v1027_v34, %v831_v35  ;;  %v877_v35 = vld [vmem:[%s1533_s0 + $0xf0] sm:$0xf] }
  0x2c   :  { %v810_v15 = vor.u32 %v1021_v10, %v807_v11 }
  0x2f   :  { %1080 = vmatpush.bf16.msrb.mxu3 %v1063_v12  ;;  %v1045_v12 = vld [vmem:[%s1533_s0 + $0x124] sm:$0xf] }
  0x31   :  { %481 = vmatmul.bf16.gmra.mxu0 %v770_v42  ;;  %v1035_v42 = vld [vmem:[%s1533_s0 + $0xd0] sm:$0xf0] }
  0x32   :  { %536 = vmatmul.bf16.gmra.mxu3 %v902_v43  ;;  %560 = vmatmul.bf16.gmra.mxu1 %v774_v44  ;;  %v862_v43 = vor.u32 %v1035_v42, %v861_v41  ;;  %v841_v44 = vld [vmem:[%s1533_s0 + $0xa8] sm:$0xf]  ;;  %v878_v41 = vor.u32 %v1040_v36, %v877_v35 }
  0x33   :  { %1081 = vmatpush.bf16.msrb.mxu3 %v1062_v14  ;;  %v806_v14 = vor.u32 %v1022_v9, %v805_v8  ;;  %v842_v51 = vor.u32 %v1031_v45, %v841_v44 }
  0x37   :  { %1082 = vmatpush.bf16.msrb.mxu3 %v1061_v16  ;;  %v906_v16 = vor.u32 %v1045_v12, %v903_v13 }
  0x3a   :  { %998 = vmatmul.msk.bf16.gmra.mxu2 %vm425_vm0, %v802_v47  ;;  %v843_v47 = vld [vmem:[%s1533_s0 + $0xb4] sm:$0xf0] }
  0x3b   :  { %1083 = vmatpush.bf16.msrb.mxu3 %v1060_v21  ;;  %v1025_v21 = vld [vmem:[%s1533_s0 + $0x80] sm:$0xf0]  ;;  %v846_v52 = vor.u32 %v1030_v46, %v843_v47 }
  0x3c   :  { %v818_v26 = vor.u32 %v1025_v21, %v817_v20 }
  0x3f   :  { %1084 = vmatpush.bf16.msrb.mxu3 %v1059_v23  ;;  %v819_v23 = vld [vmem:[%s1533_s0 + $0x84] sm:$0xf0] }
  0x40   :  { %v822_v27 = vor.u32 %v1024_v22, %v819_v23 }
  0x41   :  { %486 = vmatmul.bf16.gmra.mxu0 %v782_v54  ;;  %v873_v54 = vld [vmem:[%s1533_s0 + $0xe0] sm:$0xf] }
  0x42   :  { %541 = vmatmul.bf16.gmra.mxu3 %v914_v55  ;;  %565 = vmatmul.bf16.gmra.mxu1 %v786_v56  ;;  %v1038_v55 = vld [vmem:[%s1533_s0 + $0xe8] sm:$0xf0] }
  0x43   :  { %1085 = vmatpush.bf16.msra.mxu3 %v1117_v2  ;;  %v794_v2 = vor.u32 %v1019_v61, %v793_v60  ;;  %v874_v57 = vor.u32 %v1038_v55, %v873_v54  ;;  %v1033_v60 = vld [vmem:[%s1533_s0 + $0xc4] sm:$0xf]  ;;  %v855_v61 = vld [vmem:[%s1533_s0 + $0xcc] sm:$0xf0] }
  0x44   :  { %v858_v1 = vor.u32 %v1033_v60, %v855_v61 }
  0x47   :  { %1086 = vmatpush.bf16.msra.mxu3 %v1129_v5  ;;  %v825_v5 = vld [vmem:[%s1533_s0 + $0x80] sm:$0xf] }
  0x48   :  { %v826_v7 = vor.u32 %v1026_v6, %v825_v5  ;;  %v885_v5 = vld [vmem:[%s1533_s0 + $0xf8] sm:$0xf]  ;;  %v1041_v6 = vld [vmem:[%s1533_s0 + $0x100] sm:$0xf0] }
  0x49   :  { %v886_v10 = vor.u32 %v1041_v6, %v885_v5 }
  0x4a   :  { %999 = vmatmul.msk.bf16.gmra.mxu2 %vm425_vm0, %v814_v59  ;;  %v1034_v59 = vld [vmem:[%s1533_s0 + $0xc8] sm:$0xf0] }
  0x4b   :  { %v854_v63 = vor.u32 %v1034_v59, %v853_v58 }
  0x51   :  { %491 = vmatmul.bf16.gmra.mxu0 %v794_v2 }
  0x52   :  { %570 = vmatmul.bf16.gmra.mxu1 %v798_v3  ;;  %610 = vmatmul.bf16.vlgmr.msrb.gmra.mxu3 %v894_v4 }
  0x5a   :  { %1000 = vmatmul.msk.bf16.gmra.mxu2 %vm425_vm0, %v826_v7 }
  0x61   :  { %496 = vmatmul.bf16.gmra.mxu0 %v806_v14  ;;  %v865_v14 = vld [vmem:[%s1533_s0 + $0xd8] sm:$0xf] }
  0x62   :  { %575 = vmatmul.bf16.gmra.mxu1 %v810_v15  ;;  %615 = vmatmul.bf16.gmra.mxu3 %v906_v16  ;;  %v1037_v15 = vld [vmem:[%s1533_s0 + $0xe0] sm:$0xf0]  ;;  %v1036_v16 = vld [vmem:[%s1533_s0 + $0xdc] sm:$0xf] }
  0x63   :  { %v866_v20 = vor.u32 %v1037_v15, %v865_v14  ;;  %v870_v22 = vor.u32 %v1036_v16, %v867_v17 }
  0x6a   :  { %1001 = vmatmul.msk.bf16.gmra.mxu2 %vm425_vm0, %v838_v19 }
  0x71   :  { %501 = vmatmul.bf16.gmra.mxu0 %v818_v26  ;;  %v897_v26 = vld [vmem:[%s1533_s0 + $0x110] sm:$0xf] }
  0x72   :  { %580 = vmatmul.bf16.gmra.mxu1 %v822_v27  ;;  %620 = vmatmul.bf16.gmra.mxu3 %v918_v28  ;;  %v1044_v27 = vld [vmem:[%s1533_s0 + $0x118] sm:$0xf0] }
  0x7a   :  { %1002 = vmatmul.msk.bf16.gmra.mxu2 %vm425_vm0, %v850_v31  ;;  %v898_v31 = vor.u32 %v1044_v27, %v897_v26 }
  0x81   :  { %506 = vmatmul.bf16.gmra.mxu0 %v830_v38  ;;  %v879_v38 = vld [vmem:[%s1533_s0 + $0xfc] sm:$0xf0] }
  0x82   :  { %585 = vmatmul.bf16.gmra.mxu1 %v834_v39  ;;  %1007 = vmatmul.msk.bf16.vlgmr.msra.gmra.mxu3 %vm425_vm0, %v910_v40 }
  0x8a   :  { %1003 = vmatmul.msk.bf16.gmra.mxu2 %vm425_vm0, %v862_v43  ;;  %v882_v43 = vor.u32 %v1039_v37, %v879_v38 }
  0x8d   :  { %v635_v50 = vpop.f32.mrf.mxu2 }
  0x91   :  { %511 = vmatmul.bf16.gmra.mxu0 %v842_v51 }
  0x92   :  { %590 = vmatmul.bf16.gmra.mxu1 %v846_v52  ;;  %1008 = vmatmul.msk.bf16.gmra.mxu3 %vm425_vm0, %v922_v53 }
  0x95   :  { %v637_v56 = vpop.f32.mrf.mxu2 }
  0x9a   :  { %1004 = vmatmul.msk.bf16.gmra.mxu2 %vm425_vm0, %v874_v57 }
  0x9d   :  { %v640_v62 = vpop.f32.mrf.mxu2 }
  0x9e   :  { %v477_v0 = vpop.f32.mrf.mxu0 }
  0x9f   :  { %v556_v2 = vpop.f32.mrf.mxu1 }
  0xa0   :  { %v557_v3 = vadd.f32 %v556_v2, %v477_v0 }
  0xa1   :  { %516 = vmatmul.bf16.gmra.mxu0 %v854_v63 }
  0xa2   :  { %v1398_v4 = vadd.f32 %v635_v50, %v557_v3  ;;  %595 = vmatmul.bf16.gmra.mxu1 %v858_v1 }
  0xa5   :  { %v532_v7 = vpop.f32.mrf.mxu3  ;;  %v642_v8 = vpop.f32.mrf.mxu2 }
  0xa6   :  { %v479_v9 = vpop.f32.mrf.mxu0 }
  0xa7   :  { %v558_v11 = vpop.f32.mrf.mxu1 }
  0xa8   :  { %v559_v12 = vadd.f32 %v558_v11, %v479_v9 }
  0xaa   :  { %v1406_v13 = vadd.f32 %v637_v56, %v559_v12  ;;  %1005 = vmatmul.msk.bf16.gmra.mxu2 %vm425_vm0, %v886_v10 }
  0xad   :  { %v534_v18 = vpop.f32.mrf.mxu3  ;;  %v645_v19 = vpop.f32.mrf.mxu2 }
  0xae   :  { %v482_v21 = vpop.f32.mrf.mxu0 }
  0xaf   :  { %v561_v23 = vpop.f32.mrf.mxu1 }
  0xb0   :  { %v562_v24 = vadd.f32 %v561_v23, %v482_v21 }
  0xb1   :  { %521 = vmatmul.bf16.gmra.mxu0 %v866_v20 }
  0xb2   :  { %v1421_v25 = vadd.f32 %v640_v62, %v562_v24  ;;  %600 = vmatmul.bf16.gmra.mxu1 %v870_v22 }
  0xb5   :  { %v1429_v28 = vpop.f32.mrf.mxu3  ;;  %v647_v29 = vpop.f32.mrf.mxu2 }
  0xb6   :  { %v484_v30 = vpop.f32.mrf.mxu0 }
  0xb7   :  { %v563_v32 = vpop.f32.mrf.mxu1 }
  0xb8   :  { %v564_v33 = vadd.f32 %v563_v32, %v484_v30 }
  0xba   :  { %v1431_v34 = vadd.f32 %v642_v8, %v564_v33  ;;  %1006 = vmatmul.msk.bf16.gmra.mxu2 %vm425_vm0, %v898_v31 }
  0xbd   :  { %v1446_v39 = vpop.f32.mrf.mxu3  ;;  %v650_v40 = vpop.f32.mrf.mxu2 }
  0xbe   :  { %v487_v42 = vpop.f32.mrf.mxu0 }
  0xbf   :  { %v566_v44 = vpop.f32.mrf.mxu1 }
  0xc0   :  { %v567_v45 = vadd.f32 %v566_v44, %v487_v42 }
  0xc1   :  { %526 = vmatmul.bf16.gmra.mxu0 %v878_v41 }
  0xc2   :  { %v1448_v46 = vadd.f32 %v645_v19, %v567_v45  ;;  %605 = vmatmul.bf16.gmra.mxu1 %v882_v43 }
  0xc5   :  { %v1450_v47 = vpop.f32.mrf.mxu3  ;;  %v652_v48 = vpop.f32.mrf.mxu2 }
  0xc6   :  { %v489_v49 = vpop.f32.mrf.mxu0 }
  0xc7   :  { %v568_v50 = vpop.f32.mrf.mxu1 }
  0xc8   :  { %v569_v51 = vadd.f32 %v568_v50, %v489_v49 }
  0xca   :  { %v1452_v52 = vadd.f32 %v647_v29, %v569_v51 }
  0xcd   :  { %v1454_v53 = vpop.f32.mrf.mxu3  ;;  %v655_v54 = vpop.f32.mrf.mxu2 }
  0xce   :  { %v492_v55 = vpop.f32.mrf.mxu0 }
  0xcf   :  { %v571_v56 = vpop.f32.mrf.mxu1 }
  0xd0   :  { %v572_v57 = vadd.f32 %v571_v56, %v492_v55 }
  0xd2   :  { %v1456_v58 = vadd.f32 %v650_v40, %v572_v57 }
  0xd5   :  { %v611_v59 = vpop.f32.mrf.mxu3  ;;  %v657_v60 = vpop.f32.mrf.mxu2 }
  0xd6   :  { %v1458_v61 = vadd.f32 %v611_v59, %v532_v7  ;;  %v494_v62 = vpop.f32.mrf.mxu0 }
  0xd7   :  { %v573_v63 = vpop.f32.mrf.mxu1 }
  0xd8   :  { %v574_v0 = vadd.f32 %v573_v63, %v494_v62 }
  0xda   :  { %v653_v1 = vadd.f32 %v652_v48, %v574_v0 }
  0xdc   :  { %v705_v2 = vmax.f32 %v1398_v4, %v653_v1 }
  0xdd   :  { %v613_v3 = vpop.f32.mrf.mxu3  ;;  %v660_v5 = vpop.f32.mrf.mxu2 }
  0xde   :  { %v1461_v6 = vadd.f32 %v613_v3, %v534_v18  ;;  %v497_v8 = vpop.f32.mrf.mxu0 }
  0xdf   :  { %v576_v9 = vpop.f32.mrf.mxu1 }
  0xe0   :  { %v577_v10 = vadd.f32 %v576_v9, %v497_v8 }
  0xe2   :  { %v1463_v11 = vadd.f32 %v655_v54, %v577_v10 }
  0xe4   :  { %v708_v12 = vmax.f32 %v1406_v13, %v1463_v11 }
  0xe5   :  { %v662_v7 = vpop.f32.mrf.mxu2  ;;  %v616_v31 = vpop.f32.mrf.mxu3 }
  0xe6   :  { %v499_v14 = vpop.f32.mrf.mxu0  ;;  %v617_v10 = vadd.f32 %v616_v31, %v1429_v28 }
  0xe7   :  { %v578_v15 = vpop.f32.mrf.mxu1 }
  0xe8   :  { %v579_v16 = vadd.f32 %v578_v15, %v499_v14 }
  0xea   :  { %v1467_v17 = vadd.f32 %v657_v60, %v579_v16 }
  0xec   :  { %v711_v4 = vmax.f32 %v1421_v25, %v1467_v17 }
  0xed   :  { %v665_v19 = vpop.f32.mrf.mxu2  ;;  %v618_v41 = vpop.f32.mrf.mxu3 }
  0xee   :  { %v502_v18 = vpop.f32.mrf.mxu0 }
  0xef   :  { %v581_v20 = vpop.f32.mrf.mxu1 }
  0xf0   :  { %v582_v21 = vadd.f32 %v581_v20, %v502_v18 }
  0xf2   :  { %v661_v22 = vadd.f32 %v660_v5, %v582_v21 }
  0xf4   :  { %v714_v23 = vmax.f32 %v1431_v34, %v661_v22 }
  0xf5   :  { %v667_v24 = vpop.f32.mrf.mxu2  ;;  %v621_v50 = vpop.f32.mrf.mxu3 }
  0xf6   :  { %v504_v26 = vpop.f32.mrf.mxu0 }
  0xf7   :  { %v583_v27 = vpop.f32.mrf.mxu1 }
  0xf8   :  { %v584_v29 = vadd.f32 %v583_v27, %v504_v26  ;;  %v619_v26 = vadd.f32 %v618_v41, %v1446_v39 }
  0xfa   :  { %v663_v30 = vadd.f32 %v662_v7, %v584_v29 }
  0xfc   :  { %v717_v32 = vmax.f32 %v1448_v46, %v663_v30 }
  0xfd   :  { %v670_v33 = vpop.f32.mrf.mxu2  ;;  %v623_v60 = vpop.f32.mrf.mxu3 }
  0xfe   :  { %v507_v35 = vpop.f32.mrf.mxu0 }
  0xff   :  { %v586_v36 = vpop.f32.mrf.mxu1 }
 0x100   :  { %v587_v37 = vadd.f32 %v586_v36, %v507_v35 }
 0x102   :  { %v666_v38 = vadd.f32 %v665_v19, %v587_v37 }
 0x104   :  { %v720_v40 = vmax.f32 %v1452_v52, %v666_v38 }
 0x105   :  { %v672_v42 = vpop.f32.mrf.mxu2  ;;  %v695_v1 = vpop.f32.mrf.mxu3 }
 0x106   :  { %v509_v43 = vpop.f32.mrf.mxu0  ;;  %v696_v14 = vadd.f32 %v695_v1, %v617_v10  ;;  %v624_v1 = vadd.f32 %v623_v60, %v1454_v53 }
 0x107   :  { %v588_v44 = vpop.f32.mrf.mxu1 }
 0x108   :  { %v589_v34 = vadd.f32 %v588_v44, %v509_v43  ;;  %v622_v44 = vadd.f32 %v621_v50, %v1450_v47 }
 0x10a   :  { %v1474_v45 = vadd.f32 %v667_v24, %v589_v34 }
 0x10c   :  { %v723_v48 = vmax.f32 %v1456_v58, %v1474_v45 }
 0x10d   :  { %v1478_v49 = vpop.f32.mrf.mxu2  ;;  %v697_v16 = vpop.f32.mrf.mxu3 }
 0x10e   :  { %v512_v46 = vpop.f32.mrf.mxu0  ;;  %v698_v29 = vadd.f32 %v697_v16, %v619_v26 }
 0x10f   :  { %v591_v51 = vpop.f32.mrf.mxu1 }
 0x110   :  { %v592_v54 = vadd.f32 %v591_v51, %v512_v46 }
 0x112   :  { %v671_v55 = vadd.f32 %v670_v33, %v592_v54 }
 0x114   :  { %v1480_v56 = vmax.f32 %v705_v2, %v671_v55  ;;  %v1486_v2 = vld [vmem:[%s1534_s2] ss:$0 sm:$0xff] }
 0x115   :  { %v677_v52 = vpop.f32.mrf.mxu2  ;;  %v700_v36 = vpop.f32.mrf.mxu3 }
 0x116   :  { %v514_v57 = vpop.f32.mrf.mxu0  ;;  %v701_v46 = vadd.f32 %v700_v36, %v622_v44 }
 0x117   :  { %v593_v59 = vpop.f32.mrf.mxu1 }
 0x118   :  { %v594_v31 = vadd.f32 %v593_v59, %v514_v57 }
 0x11a   :  { %v673_v39 = vadd.f32 %v672_v42, %v594_v31 }
 0x11c   :  { %v709_v57 = vmax.f32 %v708_v12, %v673_v39 }
 0x11d   :  { %v680_v62 = vpop.f32.mrf.mxu2 }
 0x11e   :  { %v517_v63 = vpop.f32.mrf.mxu0 }
 0x11f   :  { %v596_v0 = vpop.f32.mrf.mxu1 }
 0x120   :  { %v597_v54 = vadd.f32 %v596_v0, %v517_v63 }
 0x125   :  { %v682_v3 = vpop.f32.mrf.mxu2 }
 0x126   :  { %v519_v5 = vpop.f32.mrf.mxu0 }
 0x127   :  { %v598_v8 = vpop.f32.mrf.mxu1 }
 0x128   :  { %v599_v9 = vadd.f32 %v598_v8, %v519_v5 }
 0x12a   :  { %v678_v7 = vadd.f32 %v677_v52, %v599_v9 }
 0x12c   :  { %v715_v15 = vmax.f32 %v714_v23, %v678_v7 }
 0x12d   :  { %v685_v19 = vpop.f32.mrf.mxu2 }
 0x12e   :  { %v716_v18 = vmax.f32 %v715_v15, %v696_v14  ;;  %v522_v20 = vpop.f32.mrf.mxu0 }
 0x12f   :  { %v601_v21 = vpop.f32.mrf.mxu1 }
 0x130   :  { %v733_v22 = vadd.f32 %v1486_v2, %v716_v18  ;;  %v602_v24 = vadd.f32 %v601_v21, %v522_v20 }
 0x132   :  { %v740_v27 = vmax.f32 %v733_v22, 0.0  ;;  %v681_v28 = vadd.f32 %v680_v62, %v602_v24 }
 0x134   :  { %747 = vst [vmem:[%s1535_s3 + $0x18] sm:$0xff] %v740_v27  ;;  %v718_v23 = vmax.f32 %v717_v32, %v681_v28 }
 0x135   :  { %v687_v30 = vpop.f32.mrf.mxu2 }
 0x136   :  { %v719_v33 = vmax.f32 %v718_v23, %v698_v29  ;;  %v524_v35 = vpop.f32.mrf.mxu0 }
 0x137   :  { %v603_v37 = vpop.f32.mrf.mxu1 }
 0x138   :  { %v734_v38 = vadd.f32 %v1486_v2, %v719_v33  ;;  %v604_v43 = vadd.f32 %v603_v37, %v524_v35 }
 0x13a   :  { %v741_v41 = vmax.f32 %v734_v38, 0.0  ;;  %v683_v34 = vadd.f32 %v682_v3, %v604_v43  ;;  %v702_v3 = vpop.f32.mrf.mxu3 }
 0x13c   :  { %748 = vst [vmem:[%s1535_s3 + $0x20] sm:$0xff] %v741_v41  ;;  %v721_v32 = vmax.f32 %v720_v40, %v683_v34  ;;  %v676_v40 = vadd.f32 %v1478_v49, %v597_v54 }
 0x13d   :  { %v690_v51 = vpop.f32.mrf.mxu2 }
 0x13e   :  { %v722_v55 = vmax.f32 %v721_v32, %v701_v46  ;;  %v691_v52 = vadd.f32 %v690_v51, %v1458_v61  ;;  %v527_v59 = vpop.f32.mrf.mxu0  ;;  %v703_v61 = vadd.f32 %v702_v3, %v624_v1  ;;  %v712_v60 = vmax.f32 %v711_v4, %v676_v40 }
 0x13f   :  { %v606_v47 = vpop.f32.mrf.mxu1 }
 0x140   :  { %v735_v42 = vadd.f32 %v1486_v2, %v722_v55  ;;  %v710_v50 = vmax.f32 %v709_v57, %v691_v52  ;;  %v607_v62 = vadd.f32 %v606_v47, %v527_v59 }
 0x142   :  { %v742_v5 = vmax.f32 %v735_v42, 0.0  ;;  %v731_v63 = vadd.f32 %v1486_v2, %v710_v50  ;;  %v686_v0 = vadd.f32 %v685_v19, %v607_v62 }
 0x144   :  { %749 = vst [vmem:[%s1535_s3 + $0x28] sm:$0xff] %v742_v5  ;;  %v738_v13 = vmax.f32 %v731_v63, 0.0  ;;  %v724_v11 = vmax.f32 %v723_v48, %v686_v0 }
 0x145   :  { %v692_v12 = vpop.f32.mrf.mxu2 }
 0x146   :  { %745 = vst [vmem:[%s1535_s3 + $0x8] sm:$0xff] %v738_v13  ;;  %v725_v53 = vmax.f32 %v724_v11, %v703_v61  ;;  %v693_v49 = vadd.f32 %v692_v12, %v1461_v6  ;;  %v529_v8 = vpop.f32.mrf.mxu0 }
 0x147   :  { %v608_v9 = vpop.f32.mrf.mxu1 }
 0x148   :  { %v736_v10 = vadd.f32 %v1486_v2, %v725_v53  ;;  %v713_v7 = vmax.f32 %v712_v60, %v693_v49  ;;  %v609_v14 = vadd.f32 %v608_v9, %v529_v8 }
 0x14a   :  { %v743_v58 = vmax.f32 %v736_v10, 0.0  ;;  %v732_v45 = vadd.f32 %v1486_v2, %v713_v7  ;;  %v688_v48 = vadd.f32 %v687_v30, %v609_v14 }
 0x14c   :  { %750 = vst [vmem:[%s1535_s3 + $0x30] sm:$0xff] %v743_v58  ;;  %v739_v15 = vmax.f32 %v732_v45, 0.0  ;;  %v707_v6 = vmax.f32 %v1480_v56, %v688_v48 }
 0x14e   :  { %746 = vst [vmem:[%s1535_s3 + $0x10] sm:$0xff] %v739_v15  ;;  %v730_v25 = vadd.f32 %v1486_v2, %v707_v6 }
 0x150   :  { %v737_v17 = vmax.f32 %v730_v25, 0.0 }
 0x152   :  { %744 = vst [vmem:[%s1535_s3] sm:$0xff] %v737_v17 }

// kernel: basic_cnn_forward.5
= control target key start
LH: loop header
LB: loop body
LE: loop exit
PB: predicated region body
PF: predicated region fallthrough
CT: control target
= control target key end

     0   :  { %vm877_vm0 = vcmask 523264   ;;  %s2077_s1 = inlined_call_operand.vmem [shape: bf16[1600,128], index: 1, kind: input, shape index: {}]   ;;  %s2078_s2 = inlined_call_operand.vmem [shape: f32[1,128], index: 2, kind: input, shape index: {}]   ;;  %s2079_s0 = inlined_call_operand.vmem [shape: bf16[8,1600], index: 0, kind: input, shape index: {}]   ;;  %s2080_s4 = inlined_call_operand.vmem [shape: f32[1,128], index: 4, kind: input, shape index: {}]   ;;  %s2081_s3 = inlined_call_operand.vmem [shape: bf16[128,128], index: 3, kind: input, shape index: {}]   ;;  %s2082_s5 = inlined_call_operand.vmem [shape: f32[8,128], index: 5, kind: output, shape index: {}]  }
   0x1   :  { %v1586_v0 = vld [vmem:[%s2077_s1 + $0x38] sm:$0xff]  ;;  %v1585_v4 = vld [vmem:[%s2077_s1 + $0x30] sm:$0xff]  ;;  %v1584_v8 = vld [vmem:[%s2077_s1 + $0x28] sm:$0xff] }
   0x2   :  { %v1602_v1 = vld [vmem:[%s2077_s1 + $0xb8] sm:$0xff]  ;;  %881 = vmatpush.bf16.msra.mxu0 %v1586_v0  ;;  %v1601_v5 = vld [vmem:[%s2077_s1 + $0xb0] sm:$0xff]  ;;  %v1600_v9 = vld [vmem:[%s2077_s1 + $0xa8] sm:$0xff] }
   0x3   :  { %v1610_v2 = vld [vmem:[%s2077_s1 + $0xf8] sm:$0xff]  ;;  %907 = vmatpush.bf16.msra.mxu2 %v1602_v1  ;;  %v1609_v6 = vld [vmem:[%s2077_s1 + $0xf0] sm:$0xff]  ;;  %v1608_v10 = vld [vmem:[%s2077_s1 + $0xe8] sm:$0xff] }
   0x4   :  { %v1594_v3 = vld [vmem:[%s2077_s1 + $0x78] sm:$0xff]  ;;  %920 = vmatpush.bf16.msra.mxu3 %v1610_v2  ;;  %v1593_v7 = vld [vmem:[%s2077_s1 + $0x70] sm:$0xff]  ;;  %v1592_v11 = vld [vmem:[%s2077_s1 + $0x68] sm:$0xff] }
   0x5   :  { %894 = vmatpush.bf16.msra.mxu1 %v1594_v3  ;;  %v1583_v12 = vld [vmem:[%s2077_s1 + $0x20] sm:$0xff]  ;;  %v1582_v16 = vld [vmem:[%s2077_s1 + $0x18] sm:$0xff]  ;;  %v1581_v20 = vld [vmem:[%s2077_s1 + $0x10] sm:$0xff] }
   0x6   :  { %882 = vmatpush.bf16.msra.mxu0 %v1585_v4  ;;  %v1599_v13 = vld [vmem:[%s2077_s1 + $0xa0] sm:$0xff]  ;;  %v1598_v17 = vld [vmem:[%s2077_s1 + $0x98] sm:$0xff]  ;;  %v1597_v21 = vld [vmem:[%s2077_s1 + $0x90] sm:$0xff] }
   0x7   :  { %908 = vmatpush.bf16.msra.mxu2 %v1601_v5  ;;  %v1607_v14 = vld [vmem:[%s2077_s1 + $0xe0] sm:$0xff]  ;;  %v1606_v18 = vld [vmem:[%s2077_s1 + $0xd8] sm:$0xff]  ;;  %v1605_v22 = vld [vmem:[%s2077_s1 + $0xd0] sm:$0xff] }
   0x8   :  { %921 = vmatpush.bf16.msra.mxu3 %v1609_v6  ;;  %v1591_v15 = vld [vmem:[%s2077_s1 + $0x60] sm:$0xff]  ;;  %v1590_v19 = vld [vmem:[%s2077_s1 + $0x58] sm:$0xff]  ;;  %v1589_v23 = vld [vmem:[%s2077_s1 + $0x50] sm:$0xff] }
   0x9   :  { %895 = vmatpush.bf16.msra.mxu1 %v1593_v7  ;;  %v1580_v24 = vld [vmem:[%s2077_s1 + $0x8] sm:$0xff]  ;;  %v21_v29 = vld [vmem:[%s2079_s0] sm:$0xff]  ;;  %v1618_v35 = vld [vmem:[%s2077_s1 + $0x138] sm:$0xff] }
   0xa   :  { %883 = vmatpush.bf16.msra.mxu0 %v1584_v8  ;;  %v1596_v25 = vld [vmem:[%s2077_s1 + $0x88] sm:$0xff]  ;;  %v1579_v31 = vld [vmem:[%s2077_s1] sm:$0xff]  ;;  %v239_v33 = vunpack.c.l.b16 %v21_v29  ;;  %v1634_v37 = vld [vmem:[%s2077_s1 + $0x1b8] sm:$0xff]  ;;  %v240_v41 = vunpack.c.h.b16 %v21_v29 }
   0xb   :  { %909 = vmatpush.bf16.msra.mxu2 %v1600_v9  ;;  %v22_v26 = vld [vmem:[%s2079_s0 + $0x8] sm:$0xff]  ;;  %v1595_v32 = vld [vmem:[%s2077_s1 + $0x80] sm:$0xff]  ;;  %v1642_v38 = vld [vmem:[%s2077_s1 + $0x1f8] sm:$0xff] }
   0xc   :  { %922 = vmatpush.bf16.msra.mxu3 %v1608_v10  ;;  %v1604_v27 = vld [vmem:[%s2077_s1 + $0xc8] sm:$0xff]  ;;  %v241_v30 = vunpack.c.l.b16 %v22_v26  ;;  %v1603_v34 = vld [vmem:[%s2077_s1 + $0xc0] sm:$0xff]  ;;  %v242_v36 = vunpack.c.h.b16 %v22_v26  ;;  %v1626_v42 = vld [vmem:[%s2077_s1 + $0x178] sm:$0xff]  ;;  %v252_v43 = vpack.c.b16 %v239_v33, %v239_v33  ;;  %v253_v48 = vpack.c.b16 %v240_v41, %v240_v41 }
   0xd   :  { %896 = vmatpush.bf16.msra.mxu1 %v1592_v11  ;;  %v1588_v28 = vld [vmem:[%s2077_s1 + $0x48] sm:$0xff]  ;;  %v1587_v39 = vld [vmem:[%s2077_s1 + $0x40] sm:$0xff]  ;;  %v1617_v44 = vld [vmem:[%s2077_s1 + $0x130] sm:$0xff] }
   0xe   :  { %884 = vmatpush.bf16.msra.mxu0 %v1583_v12  ;;  %v254_v40 = vpack.c.b16 %v241_v30, %v241_v30  ;;  %v255_v45 = vpack.c.b16 %v242_v36, %v242_v36  ;;  %v1633_v46 = vld [vmem:[%s2077_s1 + $0x1b0] sm:$0xff]  ;;  %v1616_v50 = vld [vmem:[%s2077_s1 + $0x128] sm:$0xff]  ;;  %v1615_v54 = vld [vmem:[%s2077_s1 + $0x120] sm:$0xff] }
   0xf   :  { %910 = vmatpush.bf16.msra.mxu2 %v1599_v13  ;;  %v1641_v47 = vld [vmem:[%s2077_s1 + $0x1f0] sm:$0xff]  ;;  %v1632_v51 = vld [vmem:[%s2077_s1 + $0x1a8] sm:$0xff]  ;;  %v1631_v55 = vld [vmem:[%s2077_s1 + $0x1a0] sm:$0xff] }
  0x10   :  { %923 = vmatpush.bf16.msra.mxu3 %v1607_v14  ;;  %v1625_v49 = vld [vmem:[%s2077_s1 + $0x170] sm:$0xff]  ;;  %v1640_v52 = vld [vmem:[%s2077_s1 + $0x1e8] sm:$0xff]  ;;  %v1639_v56 = vld [vmem:[%s2077_s1 + $0x1e0] sm:$0xff] }
  0x11   :  { %897 = vmatpush.bf16.msra.mxu1 %v1591_v15  ;;  %v1624_v53 = vld [vmem:[%s2077_s1 + $0x168] sm:$0xff]  ;;  %v1623_v57 = vld [vmem:[%s2077_s1 + $0x160] sm:$0xff]  ;;  %v1614_v58 = vld [vmem:[%s2077_s1 + $0x118] sm:$0xff] }
  0x12   :  { %885 = vmatpush.bf16.msra.mxu0 %v1582_v16  ;;  %v1630_v59 = vld [vmem:[%s2077_s1 + $0x198] sm:$0xff]  ;;  %v1613_v62 = vld [vmem:[%s2077_s1 + $0x110] sm:$0xff]  ;;  %v1612_v2 = vld [vmem:[%s2077_s1 + $0x108] sm:$0xff] }
  0x13   :  { %911 = vmatpush.bf16.msra.mxu2 %v1598_v17  ;;  %v1638_v60 = vld [vmem:[%s2077_s1 + $0x1d8] sm:$0xff]  ;;  %v1629_v63 = vld [vmem:[%s2077_s1 + $0x190] sm:$0xff]  ;;  %v1628_v3 = vld [vmem:[%s2077_s1 + $0x188] sm:$0xff] }
  0x14   :  { %924 = vmatpush.bf16.msra.mxu3 %v1606_v18  ;;  %v1622_v61 = vld [vmem:[%s2077_s1 + $0x158] sm:$0xff]  ;;  %v1637_v0 = vld [vmem:[%s2077_s1 + $0x1d0] sm:$0xff]  ;;  %v1636_v4 = vld [vmem:[%s2077_s1 + $0x1c8] sm:$0xff] }
  0x15   :  { %898 = vmatpush.bf16.msra.mxu1 %v1590_v19  ;;  %v1621_v1 = vld [vmem:[%s2077_s1 + $0x150] sm:$0xff]  ;;  %v24_v5 = vld [vmem:[%s2079_s0 + $0x18] sm:$0xff]  ;;  %v1620_v7 = vld [vmem:[%s2077_s1 + $0x148] sm:$0xff] }
  0x16   :  { %886 = vmatpush.bf16.msra.mxu0 %v1581_v20  ;;  %v23_v6 = vld [vmem:[%s2079_s0 + $0x10] sm:$0xff]  ;;  %v1611_v8 = vld [vmem:[%s2077_s1 + $0x100] sm:$0xff]  ;;  %v245_v9 = vunpack.c.l.b16 %v24_v5  ;;  %v246_v13 = vunpack.c.h.b16 %v24_v5  ;;  %v1650_v14 = vld [vmem:[%s2077_s1 + $0x238] sm:$0xff] }
  0x17   :  { %912 = vmatpush.bf16.msra.mxu2 %v1597_v21  ;;  %v1627_v10 = vld [vmem:[%s2077_s1 + $0x180] sm:$0xff]  ;;  %v243_v12 = vunpack.c.l.b16 %v23_v6  ;;  %v1666_v15 = vld [vmem:[%s2077_s1 + $0x2b8] sm:$0xff]  ;;  %v244_v18 = vunpack.c.h.b16 %v23_v6  ;;  %v1664_v29 = vld [vmem:[%s2077_s1 + $0x2a8] sm:$0xff] }
  0x18   :  { %925 = vmatpush.bf16.msra.mxu3 %v1605_v22  ;;  %v1635_v11 = vld [vmem:[%s2077_s1 + $0x1c0] sm:$0xff]  ;;  %v1674_v16 = vld [vmem:[%s2077_s1 + $0x2f8] sm:$0xff]  ;;  %v258_v20 = vpack.c.b16 %v245_v9, %v245_v9  ;;  %v259_v22 = vpack.c.b16 %v246_v13, %v246_v13  ;;  %v1672_v30 = vld [vmem:[%s2077_s1 + $0x2e8] sm:$0xff] }
  0x19   :  { %899 = vmatpush.bf16.msra.mxu1 %v1589_v23  ;;  %v1619_v17 = vld [vmem:[%s2077_s1 + $0x140] sm:$0xff]  ;;  %v1658_v19 = vld [vmem:[%s2077_s1 + $0x278] sm:$0xff]  ;;  %v256_v21 = vpack.c.b16 %v243_v12, %v243_v12  ;;  %v1649_v23 = vld [vmem:[%s2077_s1 + $0x230] sm:$0xff]  ;;  %v257_v26 = vpack.c.b16 %v244_v18, %v244_v18 }
  0x1a   :  { %887 = vmatpush.bf16.msra.mxu0 %v1580_v24  ;;  %v1665_v24 = vld [vmem:[%s2077_s1 + $0x2b0] sm:$0xff]  ;;  %v1663_v33 = vld [vmem:[%s2077_s1 + $0x2a0] sm:$0xff]  ;;  %v1646_v36 = vld [vmem:[%s2077_s1 + $0x218] sm:$0xff] }
  0x1b   :  { %913 = vmatpush.bf16.msra.mxu2 %v1596_v25  ;;  %v1673_v25 = vld [vmem:[%s2077_s1 + $0x2f0] sm:$0xff]  ;;  %v1684_v13 = vld [vmem:[%s2081_s3 + $0x28] sm:$0xff] }
  0x1c   :  { %926 = vmatpush.bf16.msra.mxu3 %v1604_v27  ;;  %v1657_v27 = vld [vmem:[%s2077_s1 + $0x270] sm:$0xff] }
  0x1d   :  { %900 = vmatpush.bf16.msra.mxu1 %v1588_v28  ;;  %v1648_v28 = vld [vmem:[%s2077_s1 + $0x228] sm:$0xff]  ;;  %v1661_v41 = vld [vmem:[%s2077_s1 + $0x290] sm:$0xff] }
  0x1e   :  { %888 = vmatpush.bf16.msra.mxu0 %v1579_v31  ;;  %v1656_v31 = vld [vmem:[%s2077_s1 + $0x268] sm:$0xff] }
  0x1f   :  { %914 = vmatpush.bf16.msra.mxu2 %v1595_v32  ;;  %v1647_v32 = vld [vmem:[%s2077_s1 + $0x220] sm:$0xff] }
  0x20   :  { %927 = vmatpush.bf16.msra.mxu3 %v1603_v34  ;;  %v1671_v34 = vld [vmem:[%s2077_s1 + $0x2e0] sm:$0xff] }
  0x21   :  { %901 = vmatpush.bf16.msra.mxu1 %v1587_v39  ;;  %889 = vmatmul.bf16.vlgmr.msra.gmra.mxu0 %v252_v43  ;;  %v1654_v39 = vld [vmem:[%s2077_s1 + $0x258] sm:$0xff]  ;;  %v1653_v43 = vld [vmem:[%s2077_s1 + $0x250] sm:$0xff] }
  0x22   :  { %933 = vmatpush.bf16.msrb.mxu0 %v1618_v35  ;;  %915 = vmatmul.bf16.vlgmr.msra.gmra.mxu2 %v254_v40  ;;  %v1655_v35 = vld [vmem:[%s2077_s1 + $0x260] sm:$0xff]  ;;  %v1645_v40 = vld [vmem:[%s2077_s1 + $0x210] sm:$0xff] }
  0x23   :  { %959 = vmatpush.bf16.msrb.mxu2 %v1634_v37  ;;  %928 = vmatmul.bf16.vlgmr.msra.gmra.mxu3 %v255_v45  ;;  %v1662_v37 = vld [vmem:[%s2077_s1 + $0x298] sm:$0xff]  ;;  %v1660_v45 = vld [vmem:[%s2077_s1 + $0x288] sm:$0xff] }
  0x24   :  { %972 = vmatpush.bf16.msrb.mxu3 %v1642_v38  ;;  %902 = vmatmul.bf16.vlgmr.msra.gmra.mxu1 %v253_v48  ;;  %v1670_v38 = vld [vmem:[%s2077_s1 + $0x2d8] sm:$0xff]  ;;  %v1668_v48 = vld [vmem:[%s2077_s1 + $0x2c8] sm:$0xff] }
  0x25   :  { %946 = vmatpush.bf16.msrb.mxu1 %v1626_v42  ;;  %v1669_v42 = vld [vmem:[%s2077_s1 + $0x2d0] sm:$0xff] }
  0x26   :  { %934 = vmatpush.bf16.msrb.mxu0 %v1617_v44  ;;  %v1644_v44 = vld [vmem:[%s2077_s1 + $0x208] sm:$0xff] }
  0x27   :  { %960 = vmatpush.bf16.msrb.mxu2 %v1633_v46  ;;  %v25_v46 = vld [vmem:[%s2079_s0 + $0x20] sm:$0xff] }
  0x28   :  { %973 = vmatpush.bf16.msrb.mxu3 %v1641_v47  ;;  %v26_v47 = vld [vmem:[%s2079_s0 + $0x28] sm:$0xff] }
  0x29   :  { %947 = vmatpush.bf16.msrb.mxu1 %v1625_v49  ;;  %v1652_v49 = vld [vmem:[%s2077_s1 + $0x248] sm:$0xff] }
  0x2a   :  { %935 = vmatpush.bf16.msrb.mxu0 %v1616_v50  ;;  %v247_v50 = vunpack.c.l.b16 %v25_v46 }
  0x2b   :  { %961 = vmatpush.bf16.msrb.mxu2 %v1632_v51  ;;  %v249_v51 = vunpack.c.l.b16 %v26_v47 }
  0x2c   :  { %974 = vmatpush.bf16.msrb.mxu3 %v1640_v52  ;;  %v1643_v52 = vld [vmem:[%s2077_s1 + $0x200] sm:$0xff] }
  0x2d   :  { %948 = vmatpush.bf16.msrb.mxu1 %v1624_v53  ;;  %v1659_v53 = vld [vmem:[%s2077_s1 + $0x280] sm:$0xff] }
  0x2e   :  { %936 = vmatpush.bf16.msrb.mxu0 %v1615_v54  ;;  %v250_v54 = vunpack.c.h.b16 %v26_v47 }
  0x2f   :  { %962 = vmatpush.bf16.msrb.mxu2 %v1631_v55  ;;  %v1667_v55 = vld [vmem:[%s2077_s1 + $0x2c0] sm:$0xff] }
  0x30   :  { %975 = vmatpush.bf16.msrb.mxu3 %v1639_v56  ;;  %v1678_v56 = vld [vmem:[%s2077_s1 + $0x318] sm:$0xff] }
  0x31   :  { %949 = vmatpush.bf16.msrb.mxu1 %v1623_v57  ;;  %v248_v57 = vunpack.c.h.b16 %v25_v46 }
  0x32   :  { %937 = vmatpush.bf16.msrb.mxu0 %v1614_v58  ;;  %v1651_v58 = vld [vmem:[%s2077_s1 + $0x240] sm:$0xff] }
  0x33   :  { %963 = vmatpush.bf16.msrb.mxu2 %v1630_v59  ;;  %v260_v59 = vpack.c.b16 %v247_v50, %v247_v50 }
  0x34   :  { %976 = vmatpush.bf16.msrb.mxu3 %v1638_v60  ;;  %v262_v60 = vpack.c.b16 %v249_v51, %v249_v51 }
  0x35   :  { %950 = vmatpush.bf16.msrb.mxu1 %v1622_v61  ;;  %v263_v61 = vpack.c.b16 %v250_v54, %v250_v54  ;;  %v1688_v54 = vld [vmem:[%s2080_s4] ss:$0 sm:$0xff] }
  0x36   :  { %938 = vmatpush.bf16.msrb.mxu0 %v1613_v62  ;;  %v261_v62 = vpack.c.b16 %v248_v57, %v248_v57 }
  0x37   :  { %964 = vmatpush.bf16.msrb.mxu2 %v1629_v63  ;;  %v1677_v63 = vld [vmem:[%s2077_s1 + $0x310] sm:$0xff] }
  0x38   :  { %977 = vmatpush.bf16.msrb.mxu3 %v1637_v0  ;;  %v1676_v0 = vld [vmem:[%s2077_s1 + $0x308] sm:$0xff] }
  0x39   :  { %951 = vmatpush.bf16.msrb.mxu1 %v1621_v1  ;;  %v27_v1 = vld [vmem:[%s2079_s0 + $0x30] sm:$0xf] }
  0x3a   :  { %939 = vmatpush.bf16.msrb.mxu0 %v1612_v2  ;;  %v1675_v2 = vld [vmem:[%s2077_s1 + $0x300] sm:$0xff] }
  0x3b   :  { %965 = vmatpush.bf16.msrb.mxu2 %v1628_v3  ;;  %v251_v3 = vunpack.c.l.b16 %v27_v1 }
  0x3c   :  { %978 = vmatpush.bf16.msrb.mxu3 %v1636_v4 }
  0x3d   :  { %952 = vmatpush.bf16.msrb.mxu1 %v1620_v7  ;;  %v264_v4 = vpack.c.b16 %v251_v3, %v251_v3 }
  0x3e   :  { %940 = vmatpush.bf16.msrb.mxu0 %v1611_v8  ;;  %v1686_v8 = vld [vmem:[%s2081_s3 + $0x38] sm:$0xff] }
  0x3f   :  { %966 = vmatpush.bf16.msrb.mxu2 %v1627_v10 }
  0x40   :  { %979 = vmatpush.bf16.msrb.mxu3 %v1635_v11  ;;  %v1685_v11 = vld [vmem:[%s2081_s3 + $0x30] sm:$0xff] }
  0x41   :  { %953 = vmatpush.bf16.msrb.mxu1 %v1619_v17  ;;  %941 = vmatmul.bf16.vlgmr.msrb.gmra.mxu0 %v256_v21  ;;  %v1687_v17 = vld [vmem:[%s2078_s2] ss:$0 sm:$0xff] }
  0x42   :  { %985 = vmatpush.bf16.msra.mxu0 %v1650_v14  ;;  %967 = vmatmul.bf16.vlgmr.msrb.gmra.mxu2 %v258_v20 }
  0x43   :  { %1011 = vmatpush.bf16.msra.mxu2 %v1666_v15  ;;  %980 = vmatmul.bf16.vlgmr.msrb.gmra.mxu3 %v259_v22 }
  0x44   :  { %1024 = vmatpush.bf16.msra.mxu3 %v1674_v16  ;;  %954 = vmatmul.bf16.vlgmr.msrb.gmra.mxu1 %v257_v26  ;;  %v1683_v16 = vld [vmem:[%s2081_s3 + $0x20] sm:$0xff] }
  0x45   :  { %998 = vmatpush.bf16.msra.mxu1 %v1658_v19  ;;  %v1682_v19 = vld [vmem:[%s2081_s3 + $0x18] sm:$0xff] }
  0x46   :  { %986 = vmatpush.bf16.msra.mxu0 %v1649_v23  ;;  %v1681_v23 = vld [vmem:[%s2081_s3 + $0x10] sm:$0xff] }
  0x47   :  { %1012 = vmatpush.bf16.msra.mxu2 %v1665_v24 }
  0x48   :  { %1025 = vmatpush.bf16.msra.mxu3 %v1673_v25 }
  0x49   :  { %999 = vmatpush.bf16.msra.mxu1 %v1657_v27  ;;  %v1680_v27 = vld [vmem:[%s2081_s3 + $0x8] sm:$0xff] }
  0x4a   :  { %987 = vmatpush.bf16.msra.mxu0 %v1648_v28 }
  0x4b   :  { %1013 = vmatpush.bf16.msra.mxu2 %v1664_v29 }
  0x4c   :  { %1026 = vmatpush.bf16.msra.mxu3 %v1672_v30 }
  0x4d   :  { %1000 = vmatpush.bf16.msra.mxu1 %v1656_v31  ;;  %v1679_v31 = vld [vmem:[%s2081_s3] sm:$0xff] }
  0x4e   :  { %988 = vmatpush.bf16.msra.mxu0 %v1647_v32 }
  0x4f   :  { %1014 = vmatpush.bf16.msra.mxu2 %v1663_v33 }
  0x50   :  { %1027 = vmatpush.bf16.msra.mxu3 %v1671_v34 }
  0x51   :  { %1001 = vmatpush.bf16.msra.mxu1 %v1655_v35 }
  0x52   :  { %989 = vmatpush.bf16.msra.mxu0 %v1646_v36 }
  0x53   :  { %1015 = vmatpush.bf16.msra.mxu2 %v1662_v37 }
  0x54   :  { %1028 = vmatpush.bf16.msra.mxu3 %v1670_v38 }
  0x55   :  { %1002 = vmatpush.bf16.msra.mxu1 %v1654_v39 }
  0x56   :  { %990 = vmatpush.bf16.msra.mxu0 %v1645_v40 }
  0x57   :  { %1016 = vmatpush.bf16.msra.mxu2 %v1661_v41 }
  0x58   :  { %1029 = vmatpush.bf16.msra.mxu3 %v1669_v42 }
  0x59   :  { %1003 = vmatpush.bf16.msra.mxu1 %v1653_v43 }
  0x5a   :  { %991 = vmatpush.bf16.msra.mxu0 %v1644_v44 }
  0x5b   :  { %1017 = vmatpush.bf16.msra.mxu2 %v1660_v45 }
  0x5c   :  { %1030 = vmatpush.bf16.msra.mxu3 %v1668_v48 }
  0x5d   :  { %1004 = vmatpush.bf16.msra.mxu1 %v1652_v49 }
  0x5e   :  { %992 = vmatpush.bf16.msra.mxu0 %v1643_v52 }
  0x5f   :  { %1018 = vmatpush.bf16.msra.mxu2 %v1659_v53 }
  0x60   :  { %1031 = vmatpush.bf16.msra.mxu3 %v1667_v55 }
  0x61   :  { %1005 = vmatpush.bf16.msra.mxu1 %v1651_v58  ;;  %993 = vmatmul.bf16.vlgmr.msra.gmra.mxu0 %v260_v59 }
  0x62   :  { %1041 = vmatpush.bf16.msrb.mxu0 %v1678_v56  ;;  %1019 = vmatmul.bf16.vlgmr.msra.gmra.mxu2 %v262_v60 }
  0x63   :  { %1032 = vmatmul.bf16.vlgmr.msra.gmra.mxu3 %v263_v61 }
  0x64   :  { %1006 = vmatmul.bf16.vlgmr.msra.gmra.mxu1 %v261_v62 }
  0x65   :  { %1119 = vmatpush.bf16.msrb.mxu1 %v1686_v8 }
  0x66   :  { %1042 = vmatpush.bf16.msrb.mxu0 %v1677_v63 }
  0x69   :  { %1120 = vmatpush.bf16.msrb.mxu1 %v1685_v11 }
  0x6a   :  { %1043 = vmatpush.bf16.msrb.mxu0 %v1676_v0 }
  0x6d   :  { %1121 = vmatpush.bf16.msrb.mxu1 %v1684_v13 }
  0x6e   :  { %1044 = vmatpush.bf16.msrb.mxu0 %v1675_v2 }
  0x71   :  { %1546 = vmatmul.msk.bf16.vlgmr.msrb.gmra.mxu0 %vm877_vm0, %v264_v4  ;;  %1122 = vmatpush.bf16.msrb.mxu1 %v1683_v16 }
  0x75   :  { %1123 = vmatpush.bf16.msrb.mxu1 %v1682_v19 }
  0x79   :  { %1124 = vmatpush.bf16.msrb.mxu1 %v1681_v23 }
  0x7d   :  { %1125 = vmatpush.bf16.msrb.mxu1 %v1680_v27 }
  0x81   :  { %1126 = vmatpush.bf16.msrb.mxu1 %v1679_v31 }
  0x9e   :  { %v890_v5 = vpop.f32.mrf.mxu0 }
  0x9f   :  { %v891_v21 = vadd.f32 %v1687_v17, %v890_v5 }
  0xa1   :  { %v903_v6 = vpop.f32.mrf.mxu1 }
  0xa2   :  { %v904_v25 = vadd.f32 %v903_v6, %v891_v21 }
  0xa5   :  { %v916_v7 = vpop.f32.mrf.mxu2 }
  0xa6   :  { %v929_v9 = vpop.f32.mrf.mxu3  ;;  %v892_v10 = vpop.f32.mrf.mxu0  ;;  %v917_v29 = vadd.f32 %v916_v7, %v904_v25 }
  0xa8   :  { %v930_v33 = vadd.f32 %v929_v9, %v917_v29 }
  0xa9   :  { %v905_v12 = vpop.f32.mrf.mxu1 }
  0xad   :  { %v918_v14 = vpop.f32.mrf.mxu2 }
  0xae   :  { %v931_v15 = vpop.f32.mrf.mxu3 }
  0xbe   :  { %v942_v18 = vpop.f32.mrf.mxu0 }
  0xbf   :  { %v943_v34 = vadd.f32 %v942_v18, %v930_v33 }
  0xc1   :  { %v955_v20 = vpop.f32.mrf.mxu1 }
  0xc2   :  { %v956_v35 = vadd.f32 %v955_v20, %v943_v34 }
  0xc5   :  { %v968_v22 = vpop.f32.mrf.mxu2 }
  0xc6   :  { %v981_v24 = vpop.f32.mrf.mxu3  ;;  %v944_v26 = vpop.f32.mrf.mxu0  ;;  %v969_v36 = vadd.f32 %v968_v22, %v956_v35 }
  0xc8   :  { %v982_v39 = vadd.f32 %v981_v24, %v969_v36 }
  0xc9   :  { %v957_v28 = vpop.f32.mrf.mxu1 }
  0xcd   :  { %v970_v30 = vpop.f32.mrf.mxu2 }
  0xce   :  { %v983_v32 = vpop.f32.mrf.mxu3 }
  0xde   :  { %v994_v37 = vpop.f32.mrf.mxu0 }
  0xdf   :  { %v995_v40 = vadd.f32 %v994_v37, %v982_v39 }
  0xe1   :  { %v1007_v38 = vpop.f32.mrf.mxu1 }
  0xe2   :  { %v1008_v44 = vadd.f32 %v1007_v38, %v995_v40 }
  0xe5   :  { %v1020_v41 = vpop.f32.mrf.mxu2 }
  0xe6   :  { %v1033_v42 = vpop.f32.mrf.mxu3  ;;  %v996_v43 = vpop.f32.mrf.mxu0  ;;  %v1021_v46 = vadd.f32 %v1020_v41, %v1008_v44 }
  0xe8   :  { %v1034_v48 = vadd.f32 %v1033_v42, %v1021_v46 }
  0xe9   :  { %v1009_v45 = vpop.f32.mrf.mxu1 }
  0xed   :  { %v1022_v47 = vpop.f32.mrf.mxu2 }
  0xee   :  { %v1035_v49 = vpop.f32.mrf.mxu3  ;;  %v1046_v50 = vpop.f32.mrf.mxu0 }
  0xef   :  { %v1047_v51 = vadd.f32 %v1046_v50, %v1034_v48 }
  0xf1   :  { %v1050_v52 = vpack.c.bf16 %v1047_v51, %v1047_v51 }
  0xf3   :  { %1127 = vmatmul.bf16.vlgmr.msrb.gmra.mxu1 %v1050_v52 }
  0xf6   :  { %v1048_v53 = vpop.f32.mrf.mxu0 }
 0x170   :  { %v1128_v55 = vpop.f32.mrf.mxu1 }
 0x171   :  { %v1129_v56 = vadd.f32 %v1688_v54, %v1128_v55 }
 0x173   :  { %1132 = vmax.xlane.f32.xlu0 %v1129_v56 }
 0x178   :  { %v1130_v57 = vpop.f32.mrf.mxu1 }
 0x1e6   :  { %v1133_v58 = vpop.xlane.xlu0 %1132 }
 0x1e7   :  { %v1134_v59 = vsub.f32 %v1129_v56, %v1133_v58 }
 0x1e9   :  { %v1135_v60 = vmul.f32 1.442695, %v1134_v59 }
 0x1eb   :  { %1689 = vpow2.f32 %v1135_v60 }
 0x1f1   :  { %v1690_v61 = vpop.eup %1689 }
 0x1f2   :  { %1137 = vadd.xlane.f32.xlu0 %v1690_v61 }
 0x265   :  { %v1138_v62 = vpop.xlane.xlu0 %1137 }
 0x266   :  { %1691 = vrcp.f32 %v1138_v62 }
 0x26c   :  { %v1692_v63 = vpop.eup %1691 }
 0x26d   :  { %v1140_v0 = vmul.f32 %v1692_v63, %v1690_v61 }
 0x26f   :  { %1141 = vst [vmem:[%s2082_s5] sm:$0xff] %v1140_v0 }

</bundles_post_ra>
